<compile_context>
chip_gen: v6e
topology: v6e:2x2x1
jax: 0.10.0
libtpu: 0.0.40
codegen_flags: <defaults>
</compile_context>

<pallas_src>
import math

import jax
import jax.numpy as jnp
import numpy as np
from jax import lax
from jax.experimental import pallas as pl
from jax.experimental.pallas import tpu as pltpu

B_J0 = 0.01      # baseline threshold
BETA = 1.8       # isAdapt=1 -> beta = 1.8
R_M = 1.0
DT = 1.0
TAU_M = 20.0                      # membrane time constant (args.tau_m)
ALPHA = math.exp(-DT / TAU_M)     # scalar, same for all neurons


def _round_up(x, m):
    return ((x + m - 1) // m) * m


def lsnn_kernel(x_ref,
                wi1_ref, b1_ref, wh1_ref,
                wi2_ref, b2_ref, wh2_ref,
                wi3_ref, b3_ref, wh3_ref,
                wo_ref, bo_ref,
                ro1_ref, ro2_ref, ro3_ref,
                out_ref,
                pre_ref):
    TN, _ = x_ref.shape
    Np = out_ref.shape[0]
    T = TN // Np
    H1 = wh1_ref.shape[0]
    H2 = wh2_ref.shape[0]
    H3 = wh3_ref.shape[0]

    f32 = jnp.float32
    alpha = f32(ALPHA)
    one_m_alpha = f32(1.0 - ALPHA)

    # Loop-invariant weights / biases / adaptive decays: load once, reuse all steps.
    wh1 = wh1_ref[...]
    wi2 = wi2_ref[...]; wh2 = wh2_ref[...]; b2 = b2_ref[...]
    wi3 = wi3_ref[...]; wh3 = wh3_ref[...]; b3 = b3_ref[...]
    ro1 = ro1_ref[...]; omr1 = 1.0 - ro1
    ro2 = ro2_ref[...]; omr2 = 1.0 - ro2
    ro3 = ro3_ref[...]; omr3 = 1.0 - ro3

    # Hoisted layer-1 input projection: one big MXU dot for all T steps at once
    # (no recurrent dependency), plus the summed layer-1 bias.
    pre_ref[...] = (jnp.dot(x_ref[...], wi1_ref[...],
                            preferred_element_type=f32) + b1_ref[...])

    def mem_update(inp, m, s, a, ro, omr):
        # mem_update_NU_adp, isAdapt=1, algo == 'LSNN'
        a_new = ro * a + omr * s                     # adaptive variable b
        thr = B_J0 + BETA * a_new                    # threshold B
        m_new = m * alpha + one_m_alpha * R_M * inp - thr * s * DT
        s_new = (m_new - thr > 0.0).astype(f32)      # ActFun_adp forward
        return m_new, s_new, a_new

    def step(t, carry):
        m1, s1, a1, m2, s2, a2, m3, s3, a3, acc = carry

        # ---- layer 1: hoisted input projection + recurrent dot ----
        h1 = pre_ref[pl.ds(t * Np, Np), :] + jnp.dot(
            s1, wh1, preferred_element_type=f32)
        m1, s1, a1 = mem_update(h1, m1, s1, a1, ro1, omr1)

        # ---- layer 2: two register-fed dots (no concat staging) ----
        h2 = (jnp.dot(s1, wi2, preferred_element_type=f32)
              + jnp.dot(s2, wh2, preferred_element_type=f32) + b2)
        m2, s2, a2 = mem_update(h2, m2, s2, a2, ro2, omr2)

        # ---- layer 3 ----
        h3 = (jnp.dot(s2, wi3, preferred_element_type=f32)
              + jnp.dot(s3, wh3, preferred_element_type=f32) + b3)
        m3, s3, a3 = mem_update(h3, m3, s3, a3, ro3, omr3)

        # spike sum for the (linear) readout, applied once after the loop
        acc = acc + s3
        return (m1, s1, a1, m2, s2, a2, m3, s3, a3, acc)

    def zeros(h):
        return jnp.zeros((Np, h), f32)

    def bj0(h):
        return jnp.full((Np, h), B_J0, f32)

    init = (zeros(H1), zeros(H1), bj0(H1),
            zeros(H2), zeros(H2), bj0(H2),
            zeros(H3), zeros(H3), bj0(H3),
            zeros(H3))

    # Full unroll for short sequences; partial unroll keeps instruction memory and
    # vreg live ranges bounded when T is large (e.g. I=1 -> T=784).
    unroll = True if T <= 16 else 8
    final = lax.fori_loop(0, T, step, init, unroll=unroll)
    acc = final[-1]

    # sum_t (spk3_t @ Wo + bo) == (sum_t spk3_t) @ Wo + T * bo
    out_ref[...] = (jnp.dot(acc, wo_ref[...], preferred_element_type=f32)
                    + f32(T) * bo_ref[...])


# ---------------- one-time, parameter-static preparation ----------------------

def prepare_params(params):
    """Pad / combine / pre-decay the parameters once (not per forward call)."""
    f32 = jnp.float32
    I = params["wi1"].shape[0]
    H3 = params["wi3"].shape[1]
    O = params["wo"].shape[1]
    Ip = _round_up(I, 128)                   # lane-aligned input features
    Op = _round_up(max(O, 128), 128)         # lane-dense readout / output stores

    wi1_pad = jnp.zeros((Ip, params["wi1"].shape[1]), f32).at[:I, :].set(params["wi1"])
    wo_pad = jnp.zeros((H3, Op), f32).at[:, :O].set(params["wo"])
    bo_pad = jnp.zeros((1, Op), f32).at[:, :O].set(params["bo"])

    return dict(
        wi1=wi1_pad, b1=params["bi1"] + params["bh1"], wh1=params["wh1"],
        wi2=params["wi2"], b2=params["bi2"] + params["bh2"], wh2=params["wh2"],
        wi3=params["wi3"], b3=params["bi3"] + params["bh3"], wh3=params["wh3"],
        wo=wo_pad, bo=bo_pad,
        ro1=jnp.exp(-DT / params["tau1"]),   # adaptive decay, constant across time
        ro2=jnp.exp(-DT / params["tau2"]),
        ro3=jnp.exp(-DT / params["tau3"]),
        in_size=I, out_size=O,
    )


def lsnn_forward(x_tmaj, prep):
    """x_tmaj: (T, N, I) float32.  prep: output of prepare_params()."""
    T, N, I = x_tmaj.shape
    assert I == prep["in_size"]
    f32 = jnp.float32

    Ip = prep["wi1"].shape[0]
    H1 = prep["wh1"].shape[0]
    Op = prep["wo"].shape[1]
    O = prep["out_size"]
    Np = _round_up(max(N, 8), 8)             # sublane-dense batch

    # zero-padded time-major input, flattened to (T*Np, Ip) so the kernel can run
    # the hoisted input projection as a single MXU dot.
    x_pad = jnp.zeros((T, Np, Ip), f32).at[:, :N, :I].set(x_tmaj.astype(f32))
    x2d = x_pad.reshape(T * Np, Ip)

    out_pad = pl.pallas_call(
        lsnn_kernel,
        out_shape=jax.ShapeDtypeStruct((Np, Op), f32),
        scratch_shapes=[pltpu.VMEM((T * Np, H1), f32)],   # hoisted layer-1 projection
    )(x2d,
      prep["wi1"], prep["b1"], prep["wh1"],
      prep["wi2"], prep["b2"], prep["wh2"],
      prep["wi3"], prep["b3"], prep["wh3"],
      prep["wo"], prep["bo"],
      prep["ro1"], prep["ro2"], prep["ro3"])

    return out_pad[:N, :O]


# ---------------- pure-JAX reference (semantics of the PyTorch module) -------

def lsnn_reference(x_tmaj, params):
    T, N, I = x_tmaj.shape
    H1 = params["wi1"].shape[1]
    H2 = params["wi2"].shape[1]
    H3 = params["wi3"].shape[1]
    O = params["wo"].shape[1]

    def upd(inp, mem, spk, b, tau):
        ro = jnp.exp(-DT / tau)
        b = ro * b + (1.0 - ro) * spk
        B = B_J0 + BETA * b
        mem = mem * ALPHA + (1.0 - ALPHA) * R_M * inp - B * spk * DT
        spk = (mem - B > 0.0).astype(jnp.float32)
        return mem, spk, b

    m1 = jnp.zeros((N, H1)); s1 = jnp.zeros((N, H1)); b1 = jnp.full((1, H1), B_J0)
    m2 = jnp.zeros((N, H2)); s2 = jnp.zeros((N, H2)); b2 = jnp.full((1, H2), B_J0)
    m3 = jnp.zeros((N, H3)); s3 = jnp.zeros((N, H3)); b3 = jnp.full((1, H3), B_J0)
    acc = jnp.zeros((N, O))
    for t in range(T):
        x = x_tmaj[t]
        h1 = x @ params["wi1"] + params["bi1"] + s1 @ params["wh1"] + params["bh1"]
        m1, s1, b1 = upd(h1, m1, s1, b1, params["tau1"])
        h2 = s1 @ params["wi2"] + params["bi2"] + s2 @ params["wh2"] + params["bh2"]
        m2, s2, b2 = upd(h2, m2, s2, b2, params["tau2"])
        h3 = s2 @ params["wi3"] + params["bi3"] + s3 @ params["wh3"] + params["bh3"]
        m3, s3, b3 = upd(h3, m3, s3, b3, params["tau3"])
        acc = acc + s3 @ params["wo"] + params["bo"]
    return acc


# ---------------- deterministic parameter construction ------------------------

def xavier_uniform(key, fan_out, fan_in):
    bound = math.sqrt(6.0 / (fan_in + fan_out))
    w = jax.random.uniform(key, (fan_out, fan_in), jnp.float32, -bound, bound)
    return w.T  # store as (in, out)


def orthogonal(key, n):
    w = jax.nn.initializers.orthogonal()(key, (n, n), jnp.float32)
    return w.T  # square; transpose to (in, out) convention


if __name__ == "__main__":
    key = jax.random.PRNGKey(0)
    keys = jax.random.split(key, 16)

    # small, self-consistent shapes:
    N = 2           # batch
    I = 98          # input_size  -> T = 784 // 98 = 8 time steps (seq=8)
    T = 784 // I
    H1 = H2 = H3 = 32   # cfg_fc
    O = 10              # output_size

    params = {
        "wi1": xavier_uniform(keys[0], H1, I),
        "bi1": jnp.zeros((1, H1), jnp.float32),
        "wh1": orthogonal(keys[1], H1),
        "bh1": jnp.zeros((1, H1), jnp.float32),
        "wi2": xavier_uniform(keys[2], H2, H1),
        "bi2": jnp.zeros((1, H2), jnp.float32),
        "wh2": orthogonal(keys[3], H2),
        "bh2": jnp.zeros((1, H2), jnp.float32),
        "wi3": xavier_uniform(keys[4], H3, H2),
        "bi3": jnp.zeros((1, H3), jnp.float32),
        "wh3": orthogonal(keys[5], H3),
        "bh3": jnp.zeros((1, H3), jnp.float32),
        "wo":  xavier_uniform(keys[6], O, H3),
        # h2o_3 bias uses PyTorch's default Linear init (uniform +-1/sqrt(fan_in))
        "bo":  jax.random.uniform(keys[7], (1, O), jnp.float32,
                                  -1.0 / math.sqrt(H3), 1.0 / math.sqrt(H3)),
        "tau1": jnp.full((1, H1), 700.0, jnp.float32),
        "tau2": jnp.full((1, H2), 700.0, jnp.float32),
        "tau3": jnp.full((1, H3), 700.0, jnp.float32),
    }

    # parameter-static prep: done once, NOT per forward call
    prep = jax.tree_util.tree_map(
        lambda x: jax.block_until_ready(x) if isinstance(x, jax.Array) else x,
        prepare_params(params))

    # module input is (N, 784); view(N, I, T) then step over last axis.
    x_flat = jax.random.normal(keys[8], (N, 784), jnp.float32)
    x_tmaj = jnp.transpose(x_flat.reshape(N, I, T), (2, 0, 1))  # (T, N, I) time-major

    out = lsnn_forward(x_tmaj, prep)
    out = jax.block_until_ready(out)

    ref = lsnn_reference(x_tmaj, params)
    np.testing.assert_allclose(np.asarray(out), np.asarray(ref), rtol=1e-3, atol=1e-3)

    print("KERNEL_OK")
</pallas_src>

<mosaic_0001>
module attributes {stable_mosaic.version = 11 : i64} {
  func.func @lsnn_kernel(%arg0: memref<64x128xf32, #tpu.memory_space<vmem>>, %arg1: memref<128x32xf32, #tpu.memory_space<vmem>>, %arg2: memref<1x32xf32, #tpu.memory_space<vmem>>, %arg3: memref<32x32xf32, #tpu.memory_space<vmem>>, %arg4: memref<32x32xf32, #tpu.memory_space<vmem>>, %arg5: memref<1x32xf32, #tpu.memory_space<vmem>>, %arg6: memref<32x32xf32, #tpu.memory_space<vmem>>, %arg7: memref<32x32xf32, #tpu.memory_space<vmem>>, %arg8: memref<1x32xf32, #tpu.memory_space<vmem>>, %arg9: memref<32x32xf32, #tpu.memory_space<vmem>>, %arg10: memref<32x128xf32, #tpu.memory_space<vmem>>, %arg11: memref<1x128xf32, #tpu.memory_space<vmem>>, %arg12: memref<1x32xf32, #tpu.memory_space<vmem>>, %arg13: memref<1x32xf32, #tpu.memory_space<vmem>>, %arg14: memref<1x32xf32, #tpu.memory_space<vmem>>, %arg15: memref<8x128xf32, #tpu.memory_space<vmem>>, %arg16: memref<64x32xf32, #tpu.memory_space<vmem>>) attributes {dimension_semantics = [], scalar_prefetch = 0 : i64, scratch_operands = 1 : i64, tpu.core_type = #tpu.core_type<tc>} {
    %c0 = arith.constant 0 : index
    %c0_0 = arith.constant 0 : index
    %0 = vector.load %arg3[%c0, %c0_0] : memref<32x32xf32, #tpu.memory_space<vmem>>, vector<32x32xf32>
    %c0_1 = arith.constant 0 : index
    %c0_2 = arith.constant 0 : index
    %1 = vector.load %arg4[%c0_1, %c0_2] : memref<32x32xf32, #tpu.memory_space<vmem>>, vector<32x32xf32>
    %c0_3 = arith.constant 0 : index
    %c0_4 = arith.constant 0 : index
    %2 = vector.load %arg6[%c0_3, %c0_4] : memref<32x32xf32, #tpu.memory_space<vmem>>, vector<32x32xf32>
    %c0_5 = arith.constant 0 : index
    %c0_6 = arith.constant 0 : index
    %3 = vector.load %arg5[%c0_5, %c0_6] : memref<1x32xf32, #tpu.memory_space<vmem>>, vector<1x32xf32>
    %c0_7 = arith.constant 0 : index
    %c0_8 = arith.constant 0 : index
    %4 = vector.load %arg7[%c0_7, %c0_8] : memref<32x32xf32, #tpu.memory_space<vmem>>, vector<32x32xf32>
    %c0_9 = arith.constant 0 : index
    %c0_10 = arith.constant 0 : index
    %5 = vector.load %arg9[%c0_9, %c0_10] : memref<32x32xf32, #tpu.memory_space<vmem>>, vector<32x32xf32>
    %c0_11 = arith.constant 0 : index
    %c0_12 = arith.constant 0 : index
    %6 = vector.load %arg8[%c0_11, %c0_12] : memref<1x32xf32, #tpu.memory_space<vmem>>, vector<1x32xf32>
    %c0_13 = arith.constant 0 : index
    %c0_14 = arith.constant 0 : index
    %7 = vector.load %arg12[%c0_13, %c0_14] : memref<1x32xf32, #tpu.memory_space<vmem>>, vector<1x32xf32>
    %cst = arith.constant 1.000000e+00 : f32
    %8 = vector.broadcast %cst : f32 to vector<1x32xf32>
    %9 = arith.subf %8, %7 : vector<1x32xf32>
    %c0_15 = arith.constant 0 : index
    %c0_16 = arith.constant 0 : index
    %10 = vector.load %arg13[%c0_15, %c0_16] : memref<1x32xf32, #tpu.memory_space<vmem>>, vector<1x32xf32>
    %cst_17 = arith.constant 1.000000e+00 : f32
    %11 = vector.broadcast %cst_17 : f32 to vector<1x32xf32>
    %12 = arith.subf %11, %10 : vector<1x32xf32>
    %c0_18 = arith.constant 0 : index
    %c0_19 = arith.constant 0 : index
    %13 = vector.load %arg14[%c0_18, %c0_19] : memref<1x32xf32, #tpu.memory_space<vmem>>, vector<1x32xf32>
    %cst_20 = arith.constant 1.000000e+00 : f32
    %14 = vector.broadcast %cst_20 : f32 to vector<1x32xf32>
    %15 = arith.subf %14, %13 : vector<1x32xf32>
    %c0_21 = arith.constant 0 : index
    %c0_22 = arith.constant 0 : index
    %16 = vector.load %arg0[%c0_21, %c0_22] : memref<64x128xf32, #tpu.memory_space<vmem>>, vector<64x128xf32>
    %c0_23 = arith.constant 0 : index
    %c0_24 = arith.constant 0 : index
    %17 = vector.load %arg1[%c0_23, %c0_24] : memref<128x32xf32, #tpu.memory_space<vmem>>, vector<128x32xf32>
    %cst_25 = arith.constant dense<0.000000e+00> : vector<64x32xf32>
    %18 = tpu.matmul %16, %17, %cst_25 {dimension_numbers = #tpu.dot_dimension_numbers<[1], [0], [0], [1], [0, 0, 1, 1], [], []>} : vector<64x128xf32>, vector<128x32xf32>, vector<64x32xf32> -> vector<64x32xf32>
    %c0_26 = arith.constant 0 : index
    %c0_27 = arith.constant 0 : index
    %19 = vector.load %arg2[%c0_26, %c0_27] : memref<1x32xf32, #tpu.memory_space<vmem>>, vector<1x32xf32>
    %20 = vector.broadcast %19 : vector<1x32xf32> to vector<64x32xf32>
    %21 = arith.addf %18, %20 : vector<64x32xf32>
    %c0_28 = arith.constant 0 : index
    %c0_29 = arith.constant 0 : index
    %22 = vector.load %arg16[%c0_28, %c0_29] : memref<64x32xf32, #tpu.memory_space<vmem>>, vector<64x32xf32>
    tpu.vector_store %arg16[%c0_28, %c0_29], %21 {strides = array<i32>} : memref<64x32xf32, #tpu.memory_space<vmem>>, vector<64x32xf32>,
    %cst_30 = arith.constant 0.000000e+00 : f32
    %23 = vector.broadcast %cst_30 : f32 to vector<8x32xf32>
    %cst_31 = arith.constant 0.000000e+00 : f32
    %24 = vector.broadcast %cst_31 : f32 to vector<8x32xf32>
    %cst_32 = arith.constant 0.00999999977 : f32
    %25 = vector.broadcast %cst_32 : f32 to vector<8x32xf32>
    %cst_33 = arith.constant 0.000000e+00 : f32
    %26 = vector.broadcast %cst_33 : f32 to vector<8x32xf32>
    %cst_34 = arith.constant 0.000000e+00 : f32
    %27 = vector.broadcast %cst_34 : f32 to vector<8x32xf32>
    %cst_35 = arith.constant 0.00999999977 : f32
    %28 = vector.broadcast %cst_35 : f32 to vector<8x32xf32>
    %cst_36 = arith.constant 0.000000e+00 : f32
    %29 = vector.broadcast %cst_36 : f32 to vector<8x32xf32>
    %cst_37 = arith.constant 0.000000e+00 : f32
    %30 = vector.broadcast %cst_37 : f32 to vector<8x32xf32>
    %cst_38 = arith.constant 0.00999999977 : f32
    %31 = vector.broadcast %cst_38 : f32 to vector<8x32xf32>
    %cst_39 = arith.constant 0.000000e+00 : f32
    %32 = vector.broadcast %cst_39 : f32 to vector<8x32xf32>
    %cst_40 = arith.constant 0.951229453 : f32
    %cst_41 = arith.constant 0.0487705767 : f32
    %c0_i32 = arith.constant 0 : i32
    %c8_i32 = arith.constant 8 : i32
    %33 = arith.muli %c0_i32, %c8_i32 : i32
    %34 = arith.index_cast %33 : i32 to index
    %c0_42 = arith.constant 0 : index
    %35 = vector.load %arg16[%34, %c0_42] : memref<64x32xf32, #tpu.memory_space<vmem>>, vector<8x32xf32>
    %cst_43 = arith.constant dense<0.000000e+00> : vector<8x32xf32>
    %36 = tpu.matmul %24, %0, %cst_43 {dimension_numbers = #tpu.dot_dimension_numbers<[1], [0], [0], [1], [0, 0, 1, 1], [], []>} : vector<8x32xf32>, vector<32x32xf32>, vector<8x32xf32> -> vector<8x32xf32>
    %37 = arith.addf %35, %36 : vector<8x32xf32>
    %38 = vector.broadcast %7 : vector<1x32xf32> to vector<8x32xf32>
    %39 = arith.mulf %38, %25 : vector<8x32xf32>
    %40 = vector.broadcast %9 : vector<1x32xf32> to vector<8x32xf32>
    %41 = arith.mulf %40, %24 : vector<8x32xf32>
    %42 = arith.addf %39, %41 : vector<8x32xf32>
    %cst_44 = arith.constant 1.800000e+00 : f32
    %43 = vector.broadcast %cst_44 : f32 to vector<8x32xf32>
    %44 = arith.mulf %43, %42 : vector<8x32xf32>
    %cst_45 = arith.constant 0.00999999977 : f32
    %45 = vector.broadcast %cst_45 : f32 to vector<8x32xf32>
    %46 = arith.addf %45, %44 : vector<8x32xf32>
    %47 = vector.broadcast %cst_40 : f32 to vector<8x32xf32>
    %48 = arith.mulf %23, %47 : vector<8x32xf32>
    %cst_46 = arith.constant 1.000000e+00 : f32
    %49 = arith.mulf %cst_41, %cst_46 : f32
    %50 = vector.broadcast %49 : f32 to vector<8x32xf32>
    %51 = arith.mulf %50, %37 : vector<8x32xf32>
    %52 = arith.addf %48, %51 : vector<8x32xf32>
    %53 = arith.mulf %46, %24 : vector<8x32xf32>
    %cst_47 = arith.constant 1.000000e+00 : f32
    %54 = vector.broadcast %cst_47 : f32 to vector<8x32xf32>
    %55 = arith.mulf %53, %54 : vector<8x32xf32>
    %56 = arith.subf %52, %55 : vector<8x32xf32>
    %57 = arith.subf %56, %46 : vector<8x32xf32>
    %cst_48 = arith.constant 0.000000e+00 : f32
    %58 = vector.broadcast %cst_48 : f32 to vector<8x32xf32>
    %59 = arith.cmpf ogt, %57, %58 : vector<8x32xf32>
    %60 = arith.extui %59 : vector<8x32xi1> to vector<8x32xi32>
    %61 = arith.sitofp %60 : vector<8x32xi32> to vector<8x32xf32>
    %cst_49 = arith.constant dense<0.000000e+00> : vector<8x32xf32>
    %62 = tpu.matmul %61, %1, %cst_49 {dimension_numbers = #tpu.dot_dimension_numbers<[1], [0], [0], [1], [0, 0, 1, 1], [], []>} : vector<8x32xf32>, vector<32x32xf32>, vector<8x32xf32> -> vector<8x32xf32>
    %cst_50 = arith.constant dense<0.000000e+00> : vector<8x32xf32>
    %63 = tpu.matmul %27, %2, %cst_50 {dimension_numbers = #tpu.dot_dimension_numbers<[1], [0], [0], [1], [0, 0, 1, 1], [], []>} : vector<8x32xf32>, vector<32x32xf32>, vector<8x32xf32> -> vector<8x32xf32>
    %64 = arith.addf %62, %63 : vector<8x32xf32>
    %65 = vector.broadcast %3 : vector<1x32xf32> to vector<8x32xf32>
    %66 = arith.addf %64, %65 : vector<8x32xf32>
    %67 = vector.broadcast %10 : vector<1x32xf32> to vector<8x32xf32>
    %68 = arith.mulf %67, %28 : vector<8x32xf32>
    %69 = vector.broadcast %12 : vector<1x32xf32> to vector<8x32xf32>
    %70 = arith.mulf %69, %27 : vector<8x32xf32>
    %71 = arith.addf %68, %70 : vector<8x32xf32>
    %cst_51 = arith.constant 1.800000e+00 : f32
    %72 = vector.broadcast %cst_51 : f32 to vector<8x32xf32>
    %73 = arith.mulf %72, %71 : vector<8x32xf32>
    %cst_52 = arith.constant 0.00999999977 : f32
    %74 = vector.broadcast %cst_52 : f32 to vector<8x32xf32>
    %75 = arith.addf %74, %73 : vector<8x32xf32>
    %76 = vector.broadcast %cst_40 : f32 to vector<8x32xf32>
    %77 = arith.mulf %26, %76 : vector<8x32xf32>
    %cst_53 = arith.constant 1.000000e+00 : f32
    %78 = arith.mulf %cst_41, %cst_53 : f32
    %79 = vector.broadcast %78 : f32 to vector<8x32xf32>
    %80 = arith.mulf %79, %66 : vector<8x32xf32>
    %81 = arith.addf %77, %80 : vector<8x32xf32>
    %82 = arith.mulf %75, %27 : vector<8x32xf32>
    %cst_54 = arith.constant 1.000000e+00 : f32
    %83 = vector.broadcast %cst_54 : f32 to vector<8x32xf32>
    %84 = arith.mulf %82, %83 : vector<8x32xf32>
    %85 = arith.subf %81, %84 : vector<8x32xf32>
    %86 = arith.subf %85, %75 : vector<8x32xf32>
    %cst_55 = arith.constant 0.000000e+00 : f32
    %87 = vector.broadcast %cst_55 : f32 to vector<8x32xf32>
    %88 = arith.cmpf ogt, %86, %87 : vector<8x32xf32>
    %89 = arith.extui %88 : vector<8x32xi1> to vector<8x32xi32>
    %90 = arith.sitofp %89 : vector<8x32xi32> to vector<8x32xf32>
    %cst_56 = arith.constant dense<0.000000e+00> : vector<8x32xf32>
    %91 = tpu.matmul %90, %4, %cst_56 {dimension_numbers = #tpu.dot_dimension_numbers<[1], [0], [0], [1], [0, 0, 1, 1], [], []>} : vector<8x32xf32>, vector<32x32xf32>, vector<8x32xf32> -> vector<8x32xf32>
    %cst_57 = arith.constant dense<0.000000e+00> : vector<8x32xf32>
    %92 = tpu.matmul %30, %5, %cst_57 {dimension_numbers = #tpu.dot_dimension_numbers<[1], [0], [0], [1], [0, 0, 1, 1], [], []>} : vector<8x32xf32>, vector<32x32xf32>, vector<8x32xf32> -> vector<8x32xf32>
    %93 = arith.addf %91, %92 : vector<8x32xf32>
    %94 = vector.broadcast %6 : vector<1x32xf32> to vector<8x32xf32>
    %95 = arith.addf %93, %94 : vector<8x32xf32>
    %96 = vector.broadcast %13 : vector<1x32xf32> to vector<8x32xf32>
    %97 = arith.mulf %96, %31 : vector<8x32xf32>
    %98 = vector.broadcast %15 : vector<1x32xf32> to vector<8x32xf32>
    %99 = arith.mulf %98, %30 : vector<8x32xf32>
    %100 = arith.addf %97, %99 : vector<8x32xf32>
    %cst_58 = arith.constant 1.800000e+00 : f32
    %101 = vector.broadcast %cst_58 : f32 to vector<8x32xf32>
    %102 = arith.mulf %101, %100 : vector<8x32xf32>
    %cst_59 = arith.constant 0.00999999977 : f32
    %103 = vector.broadcast %cst_59 : f32 to vector<8x32xf32>
    %104 = arith.addf %103, %102 : vector<8x32xf32>
    %105 = vector.broadcast %cst_40 : f32 to vector<8x32xf32>
    %106 = arith.mulf %29, %105 : vector<8x32xf32>
    %cst_60 = arith.constant 1.000000e+00 : f32
    %107 = arith.mulf %cst_41, %cst_60 : f32
    %108 = vector.broadcast %107 : f32 to vector<8x32xf32>
    %109 = arith.mulf %108, %95 : vector<8x32xf32>
    %110 = arith.addf %106, %109 : vector<8x32xf32>
    %111 = arith.mulf %104, %30 : vector<8x32xf32>
    %cst_61 = arith.constant 1.000000e+00 : f32
    %112 = vector.broadcast %cst_61 : f32 to vector<8x32xf32>
    %113 = arith.mulf %111, %112 : vector<8x32xf32>
    %114 = arith.subf %110, %113 : vector<8x32xf32>
    %115 = arith.subf %114, %104 : vector<8x32xf32>
    %cst_62 = arith.constant 0.000000e+00 : f32
    %116 = vector.broadcast %cst_62 : f32 to vector<8x32xf32>
    %117 = arith.cmpf ogt, %115, %116 : vector<8x32xf32>
    %118 = arith.extui %117 : vector<8x32xi1> to vector<8x32xi32>
    %119 = arith.sitofp %118 : vector<8x32xi32> to vector<8x32xf32>
    %120 = arith.addf %32, %119 : vector<8x32xf32>
    %c1_i32 = arith.constant 1 : i32
    %c8_i32_63 = arith.constant 8 : i32
    %121 = arith.muli %c1_i32, %c8_i32_63 : i32
    %122 = arith.index_cast %121 : i32 to index
    %c0_64 = arith.constant 0 : index
    %123 = vector.load %arg16[%122, %c0_64] : memref<64x32xf32, #tpu.memory_space<vmem>>, vector<8x32xf32>
    %cst_65 = arith.constant dense<0.000000e+00> : vector<8x32xf32>
    %124 = tpu.matmul %61, %0, %cst_65 {dimension_numbers = #tpu.dot_dimension_numbers<[1], [0], [0], [1], [0, 0, 1, 1], [], []>} : vector<8x32xf32>, vector<32x32xf32>, vector<8x32xf32> -> vector<8x32xf32>
    %125 = arith.addf %123, %124 : vector<8x32xf32>
    %126 = vector.broadcast %7 : vector<1x32xf32> to vector<8x32xf32>
    %127 = arith.mulf %126, %42 : vector<8x32xf32>
    %128 = vector.broadcast %9 : vector<1x32xf32> to vector<8x32xf32>
    %129 = arith.mulf %128, %61 : vector<8x32xf32>
    %130 = arith.addf %127, %129 : vector<8x32xf32>
    %cst_66 = arith.constant 1.800000e+00 : f32
    %131 = vector.broadcast %cst_66 : f32 to vector<8x32xf32>
    %132 = arith.mulf %131, %130 : vector<8x32xf32>
    %cst_67 = arith.constant 0.00999999977 : f32
    %133 = vector.broadcast %cst_67 : f32 to vector<8x32xf32>
    %134 = arith.addf %133, %132 : vector<8x32xf32>
    %135 = vector.broadcast %cst_40 : f32 to vector<8x32xf32>
    %136 = arith.mulf %56, %135 : vector<8x32xf32>
    %cst_68 = arith.constant 1.000000e+00 : f32
    %137 = arith.mulf %cst_41, %cst_68 : f32
    %138 = vector.broadcast %137 : f32 to vector<8x32xf32>
    %139 = arith.mulf %138, %125 : vector<8x32xf32>
    %140 = arith.addf %136, %139 : vector<8x32xf32>
    %141 = arith.mulf %134, %61 : vector<8x32xf32>
    %cst_69 = arith.constant 1.000000e+00 : f32
    %142 = vector.broadcast %cst_69 : f32 to vector<8x32xf32>
    %143 = arith.mulf %141, %142 : vector<8x32xf32>
    %144 = arith.subf %140, %143 : vector<8x32xf32>
    %145 = arith.subf %144, %134 : vector<8x32xf32>
    %cst_70 = arith.constant 0.000000e+00 : f32
    %146 = vector.broadcast %cst_70 : f32 to vector<8x32xf32>
    %147 = arith.cmpf ogt, %145, %146 : vector<8x32xf32>
    %148 = arith.extui %147 : vector<8x32xi1> to vector<8x32xi32>
    %149 = arith.sitofp %148 : vector<8x32xi32> to vector<8x32xf32>
    %cst_71 = arith.constant dense<0.000000e+00> : vector<8x32xf32>
    %150 = tpu.matmul %149, %1, %cst_71 {dimension_numbers = #tpu.dot_dimension_numbers<[1], [0], [0], [1], [0, 0, 1, 1], [], []>} : vector<8x32xf32>, vector<32x32xf32>, vector<8x32xf32> -> vector<8x32xf32>
    %cst_72 = arith.constant dense<0.000000e+00> : vector<8x32xf32>
    %151 = tpu.matmul %90, %2, %cst_72 {dimension_numbers = #tpu.dot_dimension_numbers<[1], [0], [0], [1], [0, 0, 1, 1], [], []>} : vector<8x32xf32>, vector<32x32xf32>, vector<8x32xf32> -> vector<8x32xf32>
    %152 = arith.addf %150, %151 : vector<8x32xf32>
    %153 = vector.broadcast %3 : vector<1x32xf32> to vector<8x32xf32>
    %154 = arith.addf %152, %153 : vector<8x32xf32>
    %155 = vector.broadcast %10 : vector<1x32xf32> to vector<8x32xf32>
    %156 = arith.mulf %155, %71 : vector<8x32xf32>
    %157 = vector.broadcast %12 : vector<1x32xf32> to vector<8x32xf32>
    %158 = arith.mulf %157, %90 : vector<8x32xf32>
    %159 = arith.addf %156, %158 : vector<8x32xf32>
    %cst_73 = arith.constant 1.800000e+00 : f32
    %160 = vector.broadcast %cst_73 : f32 to vector<8x32xf32>
    %161 = arith.mulf %160, %159 : vector<8x32xf32>
    %cst_74 = arith.constant 0.00999999977 : f32
    %162 = vector.broadcast %cst_74 : f32 to vector<8x32xf32>
    %163 = arith.addf %162, %161 : vector<8x32xf32>
    %164 = vector.broadcast %cst_40 : f32 to vector<8x32xf32>
    %165 = arith.mulf %85, %164 : vector<8x32xf32>
    %cst_75 = arith.constant 1.000000e+00 : f32
    %166 = arith.mulf %cst_41, %cst_75 : f32
    %167 = vector.broadcast %166 : f32 to vector<8x32xf32>
    %168 = arith.mulf %167, %154 : vector<8x32xf32>
    %169 = arith.addf %165, %168 : vector<8x32xf32>
    %170 = arith.mulf %163, %90 : vector<8x32xf32>
    %cst_76 = arith.constant 1.000000e+00 : f32
    %171 = vector.broadcast %cst_76 : f32 to vector<8x32xf32>
    %172 = arith.mulf %170, %171 : vector<8x32xf32>
    %173 = arith.subf %169, %172 : vector<8x32xf32>
    %174 = arith.subf %173, %163 : vector<8x32xf32>
    %cst_77 = arith.constant 0.000000e+00 : f32
    %175 = vector.broadcast %cst_77 : f32 to vector<8x32xf32>
    %176 = arith.cmpf ogt, %174, %175 : vector<8x32xf32>
    %177 = arith.extui %176 : vector<8x32xi1> to vector<8x32xi32>
    %178 = arith.sitofp %177 : vector<8x32xi32> to vector<8x32xf32>
    %cst_78 = arith.constant dense<0.000000e+00> : vector<8x32xf32>
    %179 = tpu.matmul %178, %4, %cst_78 {dimension_numbers = #tpu.dot_dimension_numbers<[1], [0], [0], [1], [0, 0, 1, 1], [], []>} : vector<8x32xf32>, vector<32x32xf32>, vector<8x32xf32> -> vector<8x32xf32>
    %cst_79 = arith.constant dense<0.000000e+00> : vector<8x32xf32>
    %180 = tpu.matmul %119, %5, %cst_79 {dimension_numbers = #tpu.dot_dimension_numbers<[1], [0], [0], [1], [0, 0, 1, 1], [], []>} : vector<8x32xf32>, vector<32x32xf32>, vector<8x32xf32> -> vector<8x32xf32>
    %181 = arith.addf %179, %180 : vector<8x32xf32>
    %182 = vector.broadcast %6 : vector<1x32xf32> to vector<8x32xf32>
    %183 = arith.addf %181, %182 : vector<8x32xf32>
    %184 = vector.broadcast %13 : vector<1x32xf32> to vector<8x32xf32>
    %185 = arith.mulf %184, %100 : vector<8x32xf32>
    %186 = vector.broadcast %15 : vector<1x32xf32> to vector<8x32xf32>
    %187 = arith.mulf %186, %119 : vector<8x32xf32>
    %188 = arith.addf %185, %187 : vector<8x32xf32>
    %cst_80 = arith.constant 1.800000e+00 : f32
    %189 = vector.broadcast %cst_80 : f32 to vector<8x32xf32>
    %190 = arith.mulf %189, %188 : vector<8x32xf32>
    %cst_81 = arith.constant 0.00999999977 : f32
    %191 = vector.broadcast %cst_81 : f32 to vector<8x32xf32>
    %192 = arith.addf %191, %190 : vector<8x32xf32>
    %193 = vector.broadcast %cst_40 : f32 to vector<8x32xf32>
    %194 = arith.mulf %114, %193 : vector<8x32xf32>
    %cst_82 = arith.constant 1.000000e+00 : f32
    %195 = arith.mulf %cst_41, %cst_82 : f32
    %196 = vector.broadcast %195 : f32 to vector<8x32xf32>
    %197 = arith.mulf %196, %183 : vector<8x32xf32>
    %198 = arith.addf %194, %197 : vector<8x32xf32>
    %199 = arith.mulf %192, %119 : vector<8x32xf32>
    %cst_83 = arith.constant 1.000000e+00 : f32
    %200 = vector.broadcast %cst_83 : f32 to vector<8x32xf32>
    %201 = arith.mulf %199, %200 : vector<8x32xf32>
    %202 = arith.subf %198, %201 : vector<8x32xf32>
    %203 = arith.subf %202, %192 : vector<8x32xf32>
    %cst_84 = arith.constant 0.000000e+00 : f32
    %204 = vector.broadcast %cst_84 : f32 to vector<8x32xf32>
    %205 = arith.cmpf ogt, %203, %204 : vector<8x32xf32>
    %206 = arith.extui %205 : vector<8x32xi1> to vector<8x32xi32>
    %207 = arith.sitofp %206 : vector<8x32xi32> to vector<8x32xf32>
    %208 = arith.addf %120, %207 : vector<8x32xf32>
    %c2_i32 = arith.constant 2 : i32
    %c8_i32_85 = arith.constant 8 : i32
    %209 = arith.muli %c2_i32, %c8_i32_85 : i32
    %210 = arith.index_cast %209 : i32 to index
    %c0_86 = arith.constant 0 : index
    %211 = vector.load %arg16[%210, %c0_86] : memref<64x32xf32, #tpu.memory_space<vmem>>, vector<8x32xf32>
    %cst_87 = arith.constant dense<0.000000e+00> : vector<8x32xf32>
    %212 = tpu.matmul %149, %0, %cst_87 {dimension_numbers = #tpu.dot_dimension_numbers<[1], [0], [0], [1], [0, 0, 1, 1], [], []>} : vector<8x32xf32>, vector<32x32xf32>, vector<8x32xf32> -> vector<8x32xf32>
    %213 = arith.addf %211, %212 : vector<8x32xf32>
    %214 = vector.broadcast %7 : vector<1x32xf32> to vector<8x32xf32>
    %215 = arith.mulf %214, %130 : vector<8x32xf32>
    %216 = vector.broadcast %9 : vector<1x32xf32> to vector<8x32xf32>
    %217 = arith.mulf %216, %149 : vector<8x32xf32>
    %218 = arith.addf %215, %217 : vector<8x32xf32>
    %cst_88 = arith.constant 1.800000e+00 : f32
    %219 = vector.broadcast %cst_88 : f32 to vector<8x32xf32>
    %220 = arith.mulf %219, %218 : vector<8x32xf32>
    %cst_89 = arith.constant 0.00999999977 : f32
    %221 = vector.broadcast %cst_89 : f32 to vector<8x32xf32>
    %222 = arith.addf %221, %220 : vector<8x32xf32>
    %223 = vector.broadcast %cst_40 : f32 to vector<8x32xf32>
    %224 = arith.mulf %144, %223 : vector<8x32xf32>
    %cst_90 = arith.constant 1.000000e+00 : f32
    %225 = arith.mulf %cst_41, %cst_90 : f32
    %226 = vector.broadcast %225 : f32 to vector<8x32xf32>
    %227 = arith.mulf %226, %213 : vector<8x32xf32>
    %228 = arith.addf %224, %227 : vector<8x32xf32>
    %229 = arith.mulf %222, %149 : vector<8x32xf32>
    %cst_91 = arith.constant 1.000000e+00 : f32
    %230 = vector.broadcast %cst_91 : f32 to vector<8x32xf32>
    %231 = arith.mulf %229, %230 : vector<8x32xf32>
    %232 = arith.subf %228, %231 : vector<8x32xf32>
    %233 = arith.subf %232, %222 : vector<8x32xf32>
    %cst_92 = arith.constant 0.000000e+00 : f32
    %234 = vector.broadcast %cst_92 : f32 to vector<8x32xf32>
    %235 = arith.cmpf ogt, %233, %234 : vector<8x32xf32>
    %236 = arith.extui %235 : vector<8x32xi1> to vector<8x32xi32>
    %237 = arith.sitofp %236 : vector<8x32xi32> to vector<8x32xf32>
    %cst_93 = arith.constant dense<0.000000e+00> : vector<8x32xf32>
    %238 = tpu.matmul %237, %1, %cst_93 {dimension_numbers = #tpu.dot_dimension_numbers<[1], [0], [0], [1], [0, 0, 1, 1], [], []>} : vector<8x32xf32>, vector<32x32xf32>, vector<8x32xf32> -> vector<8x32xf32>
    %cst_94 = arith.constant dense<0.000000e+00> : vector<8x32xf32>
    %239 = tpu.matmul %178, %2, %cst_94 {dimension_numbers = #tpu.dot_dimension_numbers<[1], [0], [0], [1], [0, 0, 1, 1], [], []>} : vector<8x32xf32>, vector<32x32xf32>, vector<8x32xf32> -> vector<8x32xf32>
    %240 = arith.addf %238, %239 : vector<8x32xf32>
    %241 = vector.broadcast %3 : vector<1x32xf32> to vector<8x32xf32>
    %242 = arith.addf %240, %241 : vector<8x32xf32>
    %243 = vector.broadcast %10 : vector<1x32xf32> to vector<8x32xf32>
    %244 = arith.mulf %243, %159 : vector<8x32xf32>
    %245 = vector.broadcast %12 : vector<1x32xf32> to vector<8x32xf32>
    %246 = arith.mulf %245, %178 : vector<8x32xf32>
    %247 = arith.addf %244, %246 : vector<8x32xf32>
    %cst_95 = arith.constant 1.800000e+00 : f32
    %248 = vector.broadcast %cst_95 : f32 to vector<8x32xf32>
    %249 = arith.mulf %248, %247 : vector<8x32xf32>
    %cst_96 = arith.constant 0.00999999977 : f32
    %250 = vector.broadcast %cst_96 : f32 to vector<8x32xf32>
    %251 = arith.addf %250, %249 : vector<8x32xf32>
    %252 = vector.broadcast %cst_40 : f32 to vector<8x32xf32>
    %253 = arith.mulf %173, %252 : vector<8x32xf32>
    %cst_97 = arith.constant 1.000000e+00 : f32
    %254 = arith.mulf %cst_41, %cst_97 : f32
    %255 = vector.broadcast %254 : f32 to vector<8x32xf32>
    %256 = arith.mulf %255, %242 : vector<8x32xf32>
    %257 = arith.addf %253, %256 : vector<8x32xf32>
    %258 = arith.mulf %251, %178 : vector<8x32xf32>
    %cst_98 = arith.constant 1.000000e+00 : f32
    %259 = vector.broadcast %cst_98 : f32 to vector<8x32xf32>
    %260 = arith.mulf %258, %259 : vector<8x32xf32>
    %261 = arith.subf %257, %260 : vector<8x32xf32>
    %262 = arith.subf %261, %251 : vector<8x32xf32>
    %cst_99 = arith.constant 0.000000e+00 : f32
    %263 = vector.broadcast %cst_99 : f32 to vector<8x32xf32>
    %264 = arith.cmpf ogt, %262, %263 : vector<8x32xf32>
    %265 = arith.extui %264 : vector<8x32xi1> to vector<8x32xi32>
    %266 = arith.sitofp %265 : vector<8x32xi32> to vector<8x32xf32>
    %cst_100 = arith.constant dense<0.000000e+00> : vector<8x32xf32>
    %267 = tpu.matmul %266, %4, %cst_100 {dimension_numbers = #tpu.dot_dimension_numbers<[1], [0], [0], [1], [0, 0, 1, 1], [], []>} : vector<8x32xf32>, vector<32x32xf32>, vector<8x32xf32> -> vector<8x32xf32>
    %cst_101 = arith.constant dense<0.000000e+00> : vector<8x32xf32>
    %268 = tpu.matmul %207, %5, %cst_101 {dimension_numbers = #tpu.dot_dimension_numbers<[1], [0], [0], [1], [0, 0, 1, 1], [], []>} : vector<8x32xf32>, vector<32x32xf32>, vector<8x32xf32> -> vector<8x32xf32>
    %269 = arith.addf %267, %268 : vector<8x32xf32>
    %270 = vector.broadcast %6 : vector<1x32xf32> to vector<8x32xf32>
    %271 = arith.addf %269, %270 : vector<8x32xf32>
    %272 = vector.broadcast %13 : vector<1x32xf32> to vector<8x32xf32>
    %273 = arith.mulf %272, %188 : vector<8x32xf32>
    %274 = vector.broadcast %15 : vector<1x32xf32> to vector<8x32xf32>
    %275 = arith.mulf %274, %207 : vector<8x32xf32>
    %276 = arith.addf %273, %275 : vector<8x32xf32>
    %cst_102 = arith.constant 1.800000e+00 : f32
    %277 = vector.broadcast %cst_102 : f32 to vector<8x32xf32>
    %278 = arith.mulf %277, %276 : vector<8x32xf32>
    %cst_103 = arith.constant 0.00999999977 : f32
    %279 = vector.broadcast %cst_103 : f32 to vector<8x32xf32>
    %280 = arith.addf %279, %278 : vector<8x32xf32>
    %281 = vector.broadcast %cst_40 : f32 to vector<8x32xf32>
    %282 = arith.mulf %202, %281 : vector<8x32xf32>
    %cst_104 = arith.constant 1.000000e+00 : f32
    %283 = arith.mulf %cst_41, %cst_104 : f32
    %284 = vector.broadcast %283 : f32 to vector<8x32xf32>
    %285 = arith.mulf %284, %271 : vector<8x32xf32>
    %286 = arith.addf %282, %285 : vector<8x32xf32>
    %287 = arith.mulf %280, %207 : vector<8x32xf32>
    %cst_105 = arith.constant 1.000000e+00 : f32
    %288 = vector.broadcast %cst_105 : f32 to vector<8x32xf32>
    %289 = arith.mulf %287, %288 : vector<8x32xf32>
    %290 = arith.subf %286, %289 : vector<8x32xf32>
    %291 = arith.subf %290, %280 : vector<8x32xf32>
    %cst_106 = arith.constant 0.000000e+00 : f32
    %292 = vector.broadcast %cst_106 : f32 to vector<8x32xf32>
    %293 = arith.cmpf ogt, %291, %292 : vector<8x32xf32>
    %294 = arith.extui %293 : vector<8x32xi1> to vector<8x32xi32>
    %295 = arith.sitofp %294 : vector<8x32xi32> to vector<8x32xf32>
    %296 = arith.addf %208, %295 : vector<8x32xf32>
    %c3_i32 = arith.constant 3 : i32
    %c8_i32_107 = arith.constant 8 : i32
    %297 = arith.muli %c3_i32, %c8_i32_107 : i32
    %298 = arith.index_cast %297 : i32 to index
    %c0_108 = arith.constant 0 : index
    %299 = vector.load %arg16[%298, %c0_108] : memref<64x32xf32, #tpu.memory_space<vmem>>, vector<8x32xf32>
    %cst_109 = arith.constant dense<0.000000e+00> : vector<8x32xf32>
    %300 = tpu.matmul %237, %0, %cst_109 {dimension_numbers = #tpu.dot_dimension_numbers<[1], [0], [0], [1], [0, 0, 1, 1], [], []>} : vector<8x32xf32>, vector<32x32xf32>, vector<8x32xf32> -> vector<8x32xf32>
    %301 = arith.addf %299, %300 : vector<8x32xf32>
    %302 = vector.broadcast %7 : vector<1x32xf32> to vector<8x32xf32>
    %303 = arith.mulf %302, %218 : vector<8x32xf32>
    %304 = vector.broadcast %9 : vector<1x32xf32> to vector<8x32xf32>
    %305 = arith.mulf %304, %237 : vector<8x32xf32>
    %306 = arith.addf %303, %305 : vector<8x32xf32>
    %cst_110 = arith.constant 1.800000e+00 : f32
    %307 = vector.broadcast %cst_110 : f32 to vector<8x32xf32>
    %308 = arith.mulf %307, %306 : vector<8x32xf32>
    %cst_111 = arith.constant 0.00999999977 : f32
    %309 = vector.broadcast %cst_111 : f32 to vector<8x32xf32>
    %310 = arith.addf %309, %308 : vector<8x32xf32>
    %311 = vector.broadcast %cst_40 : f32 to vector<8x32xf32>
    %312 = arith.mulf %232, %311 : vector<8x32xf32>
    %cst_112 = arith.constant 1.000000e+00 : f32
    %313 = arith.mulf %cst_41, %cst_112 : f32
    %314 = vector.broadcast %313 : f32 to vector<8x32xf32>
    %315 = arith.mulf %314, %301 : vector<8x32xf32>
    %316 = arith.addf %312, %315 : vector<8x32xf32>
    %317 = arith.mulf %310, %237 : vector<8x32xf32>
    %cst_113 = arith.constant 1.000000e+00 : f32
    %318 = vector.broadcast %cst_113 : f32 to vector<8x32xf32>
    %319 = arith.mulf %317, %318 : vector<8x32xf32>
    %320 = arith.subf %316, %319 : vector<8x32xf32>
    %321 = arith.subf %320, %310 : vector<8x32xf32>
    %cst_114 = arith.constant 0.000000e+00 : f32
    %322 = vector.broadcast %cst_114 : f32 to vector<8x32xf32>
    %323 = arith.cmpf ogt, %321, %322 : vector<8x32xf32>
    %324 = arith.extui %323 : vector<8x32xi1> to vector<8x32xi32>
    %325 = arith.sitofp %324 : vector<8x32xi32> to vector<8x32xf32>
    %cst_115 = arith.constant dense<0.000000e+00> : vector<8x32xf32>
    %326 = tpu.matmul %325, %1, %cst_115 {dimension_numbers = #tpu.dot_dimension_numbers<[1], [0], [0], [1], [0, 0, 1, 1], [], []>} : vector<8x32xf32>, vector<32x32xf32>, vector<8x32xf32> -> vector<8x32xf32>
    %cst_116 = arith.constant dense<0.000000e+00> : vector<8x32xf32>
    %327 = tpu.matmul %266, %2, %cst_116 {dimension_numbers = #tpu.dot_dimension_numbers<[1], [0], [0], [1], [0, 0, 1, 1], [], []>} : vector<8x32xf32>, vector<32x32xf32>, vector<8x32xf32> -> vector<8x32xf32>
    %328 = arith.addf %326, %327 : vector<8x32xf32>
    %329 = vector.broadcast %3 : vector<1x32xf32> to vector<8x32xf32>
    %330 = arith.addf %328, %329 : vector<8x32xf32>
    %331 = vector.broadcast %10 : vector<1x32xf32> to vector<8x32xf32>
    %332 = arith.mulf %331, %247 : vector<8x32xf32>
    %333 = vector.broadcast %12 : vector<1x32xf32> to vector<8x32xf32>
    %334 = arith.mulf %333, %266 : vector<8x32xf32>
    %335 = arith.addf %332, %334 : vector<8x32xf32>
    %cst_117 = arith.constant 1.800000e+00 : f32
    %336 = vector.broadcast %cst_117 : f32 to vector<8x32xf32>
    %337 = arith.mulf %336, %335 : vector<8x32xf32>
    %cst_118 = arith.constant 0.00999999977 : f32
    %338 = vector.broadcast %cst_118 : f32 to vector<8x32xf32>
    %339 = arith.addf %338, %337 : vector<8x32xf32>
    %340 = vector.broadcast %cst_40 : f32 to vector<8x32xf32>
    %341 = arith.mulf %261, %340 : vector<8x32xf32>
    %cst_119 = arith.constant 1.000000e+00 : f32
    %342 = arith.mulf %cst_41, %cst_119 : f32
    %343 = vector.broadcast %342 : f32 to vector<8x32xf32>
    %344 = arith.mulf %343, %330 : vector<8x32xf32>
    %345 = arith.addf %341, %344 : vector<8x32xf32>
    %346 = arith.mulf %339, %266 : vector<8x32xf32>
    %cst_120 = arith.constant 1.000000e+00 : f32
    %347 = vector.broadcast %cst_120 : f32 to vector<8x32xf32>
    %348 = arith.mulf %346, %347 : vector<8x32xf32>
    %349 = arith.subf %345, %348 : vector<8x32xf32>
    %350 = arith.subf %349, %339 : vector<8x32xf32>
    %cst_121 = arith.constant 0.000000e+00 : f32
    %351 = vector.broadcast %cst_121 : f32 to vector<8x32xf32>
    %352 = arith.cmpf ogt, %350, %351 : vector<8x32xf32>
    %353 = arith.extui %352 : vector<8x32xi1> to vector<8x32xi32>
    %354 = arith.sitofp %353 : vector<8x32xi32> to vector<8x32xf32>
    %cst_122 = arith.constant dense<0.000000e+00> : vector<8x32xf32>
    %355 = tpu.matmul %354, %4, %cst_122 {dimension_numbers = #tpu.dot_dimension_numbers<[1], [0], [0], [1], [0, 0, 1, 1], [], []>} : vector<8x32xf32>, vector<32x32xf32>, vector<8x32xf32> -> vector<8x32xf32>
    %cst_123 = arith.constant dense<0.000000e+00> : vector<8x32xf32>
    %356 = tpu.matmul %295, %5, %cst_123 {dimension_numbers = #tpu.dot_dimension_numbers<[1], [0], [0], [1], [0, 0, 1, 1], [], []>} : vector<8x32xf32>, vector<32x32xf32>, vector<8x32xf32> -> vector<8x32xf32>
    %357 = arith.addf %355, %356 : vector<8x32xf32>
    %358 = vector.broadcast %6 : vector<1x32xf32> to vector<8x32xf32>
    %359 = arith.addf %357, %358 : vector<8x32xf32>
    %360 = vector.broadcast %13 : vector<1x32xf32> to vector<8x32xf32>
    %361 = arith.mulf %360, %276 : vector<8x32xf32>
    %362 = vector.broadcast %15 : vector<1x32xf32> to vector<8x32xf32>
    %363 = arith.mulf %362, %295 : vector<8x32xf32>
    %364 = arith.addf %361, %363 : vector<8x32xf32>
    %cst_124 = arith.constant 1.800000e+00 : f32
    %365 = vector.broadcast %cst_124 : f32 to vector<8x32xf32>
    %366 = arith.mulf %365, %364 : vector<8x32xf32>
    %cst_125 = arith.constant 0.00999999977 : f32
    %367 = vector.broadcast %cst_125 : f32 to vector<8x32xf32>
    %368 = arith.addf %367, %366 : vector<8x32xf32>
    %369 = vector.broadcast %cst_40 : f32 to vector<8x32xf32>
    %370 = arith.mulf %290, %369 : vector<8x32xf32>
    %cst_126 = arith.constant 1.000000e+00 : f32
    %371 = arith.mulf %cst_41, %cst_126 : f32
    %372 = vector.broadcast %371 : f32 to vector<8x32xf32>
    %373 = arith.mulf %372, %359 : vector<8x32xf32>
    %374 = arith.addf %370, %373 : vector<8x32xf32>
    %375 = arith.mulf %368, %295 : vector<8x32xf32>
    %cst_127 = arith.constant 1.000000e+00 : f32
    %376 = vector.broadcast %cst_127 : f32 to vector<8x32xf32>
    %377 = arith.mulf %375, %376 : vector<8x32xf32>
    %378 = arith.subf %374, %377 : vector<8x32xf32>
    %379 = arith.subf %378, %368 : vector<8x32xf32>
    %cst_128 = arith.constant 0.000000e+00 : f32
    %380 = vector.broadcast %cst_128 : f32 to vector<8x32xf32>
    %381 = arith.cmpf ogt, %379, %380 : vector<8x32xf32>
    %382 = arith.extui %381 : vector<8x32xi1> to vector<8x32xi32>
    %383 = arith.sitofp %382 : vector<8x32xi32> to vector<8x32xf32>
    %384 = arith.addf %296, %383 : vector<8x32xf32>
    %c4_i32 = arith.constant 4 : i32
    %c8_i32_129 = arith.constant 8 : i32
    %385 = arith.muli %c4_i32, %c8_i32_129 : i32
    %386 = arith.index_cast %385 : i32 to index
    %c0_130 = arith.constant 0 : index
    %387 = vector.load %arg16[%386, %c0_130] : memref<64x32xf32, #tpu.memory_space<vmem>>, vector<8x32xf32>
    %cst_131 = arith.constant dense<0.000000e+00> : vector<8x32xf32>
    %388 = tpu.matmul %325, %0, %cst_131 {dimension_numbers = #tpu.dot_dimension_numbers<[1], [0], [0], [1], [0, 0, 1, 1], [], []>} : vector<8x32xf32>, vector<32x32xf32>, vector<8x32xf32> -> vector<8x32xf32>
    %389 = arith.addf %387, %388 : vector<8x32xf32>
    %390 = vector.broadcast %7 : vector<1x32xf32> to vector<8x32xf32>
    %391 = arith.mulf %390, %306 : vector<8x32xf32>
    %392 = vector.broadcast %9 : vector<1x32xf32> to vector<8x32xf32>
    %393 = arith.mulf %392, %325 : vector<8x32xf32>
    %394 = arith.addf %391, %393 : vector<8x32xf32>
    %cst_132 = arith.constant 1.800000e+00 : f32
    %395 = vector.broadcast %cst_132 : f32 to vector<8x32xf32>
    %396 = arith.mulf %395, %394 : vector<8x32xf32>
    %cst_133 = arith.constant 0.00999999977 : f32
    %397 = vector.broadcast %cst_133 : f32 to vector<8x32xf32>
    %398 = arith.addf %397, %396 : vector<8x32xf32>
    %399 = vector.broadcast %cst_40 : f32 to vector<8x32xf32>
    %400 = arith.mulf %320, %399 : vector<8x32xf32>
    %cst_134 = arith.constant 1.000000e+00 : f32
    %401 = arith.mulf %cst_41, %cst_134 : f32
    %402 = vector.broadcast %401 : f32 to vector<8x32xf32>
    %403 = arith.mulf %402, %389 : vector<8x32xf32>
    %404 = arith.addf %400, %403 : vector<8x32xf32>
    %405 = arith.mulf %398, %325 : vector<8x32xf32>
    %cst_135 = arith.constant 1.000000e+00 : f32
    %406 = vector.broadcast %cst_135 : f32 to vector<8x32xf32>
    %407 = arith.mulf %405, %406 : vector<8x32xf32>
    %408 = arith.subf %404, %407 : vector<8x32xf32>
    %409 = arith.subf %408, %398 : vector<8x32xf32>
    %cst_136 = arith.constant 0.000000e+00 : f32
    %410 = vector.broadcast %cst_136 : f32 to vector<8x32xf32>
    %411 = arith.cmpf ogt, %409, %410 : vector<8x32xf32>
    %412 = arith.extui %411 : vector<8x32xi1> to vector<8x32xi32>
    %413 = arith.sitofp %412 : vector<8x32xi32> to vector<8x32xf32>
    %cst_137 = arith.constant dense<0.000000e+00> : vector<8x32xf32>
    %414 = tpu.matmul %413, %1, %cst_137 {dimension_numbers = #tpu.dot_dimension_numbers<[1], [0], [0], [1], [0, 0, 1, 1], [], []>} : vector<8x32xf32>, vector<32x32xf32>, vector<8x32xf32> -> vector<8x32xf32>
    %cst_138 = arith.constant dense<0.000000e+00> : vector<8x32xf32>
    %415 = tpu.matmul %354, %2, %cst_138 {dimension_numbers = #tpu.dot_dimension_numbers<[1], [0], [0], [1], [0, 0, 1, 1], [], []>} : vector<8x32xf32>, vector<32x32xf32>, vector<8x32xf32> -> vector<8x32xf32>
    %416 = arith.addf %414, %415 : vector<8x32xf32>
    %417 = vector.broadcast %3 : vector<1x32xf32> to vector<8x32xf32>
    %418 = arith.addf %416, %417 : vector<8x32xf32>
    %419 = vector.broadcast %10 : vector<1x32xf32> to vector<8x32xf32>
    %420 = arith.mulf %419, %335 : vector<8x32xf32>
    %421 = vector.broadcast %12 : vector<1x32xf32> to vector<8x32xf32>
    %422 = arith.mulf %421, %354 : vector<8x32xf32>
    %423 = arith.addf %420, %422 : vector<8x32xf32>
    %cst_139 = arith.constant 1.800000e+00 : f32
    %424 = vector.broadcast %cst_139 : f32 to vector<8x32xf32>
    %425 = arith.mulf %424, %423 : vector<8x32xf32>
    %cst_140 = arith.constant 0.00999999977 : f32
    %426 = vector.broadcast %cst_140 : f32 to vector<8x32xf32>
    %427 = arith.addf %426, %425 : vector<8x32xf32>
    %428 = vector.broadcast %cst_40 : f32 to vector<8x32xf32>
    %429 = arith.mulf %349, %428 : vector<8x32xf32>
    %cst_141 = arith.constant 1.000000e+00 : f32
    %430 = arith.mulf %cst_41, %cst_141 : f32
    %431 = vector.broadcast %430 : f32 to vector<8x32xf32>
    %432 = arith.mulf %431, %418 : vector<8x32xf32>
    %433 = arith.addf %429, %432 : vector<8x32xf32>
    %434 = arith.mulf %427, %354 : vector<8x32xf32>
    %cst_142 = arith.constant 1.000000e+00 : f32
    %435 = vector.broadcast %cst_142 : f32 to vector<8x32xf32>
    %436 = arith.mulf %434, %435 : vector<8x32xf32>
    %437 = arith.subf %433, %436 : vector<8x32xf32>
    %438 = arith.subf %437, %427 : vector<8x32xf32>
    %cst_143 = arith.constant 0.000000e+00 : f32
    %439 = vector.broadcast %cst_143 : f32 to vector<8x32xf32>
    %440 = arith.cmpf ogt, %438, %439 : vector<8x32xf32>
    %441 = arith.extui %440 : vector<8x32xi1> to vector<8x32xi32>
    %442 = arith.sitofp %441 : vector<8x32xi32> to vector<8x32xf32>
    %cst_144 = arith.constant dense<0.000000e+00> : vector<8x32xf32>
    %443 = tpu.matmul %442, %4, %cst_144 {dimension_numbers = #tpu.dot_dimension_numbers<[1], [0], [0], [1], [0, 0, 1, 1], [], []>} : vector<8x32xf32>, vector<32x32xf32>, vector<8x32xf32> -> vector<8x32xf32>
    %cst_145 = arith.constant dense<0.000000e+00> : vector<8x32xf32>
    %444 = tpu.matmul %383, %5, %cst_145 {dimension_numbers = #tpu.dot_dimension_numbers<[1], [0], [0], [1], [0, 0, 1, 1], [], []>} : vector<8x32xf32>, vector<32x32xf32>, vector<8x32xf32> -> vector<8x32xf32>
    %445 = arith.addf %443, %444 : vector<8x32xf32>
    %446 = vector.broadcast %6 : vector<1x32xf32> to vector<8x32xf32>
    %447 = arith.addf %445, %446 : vector<8x32xf32>
    %448 = vector.broadcast %13 : vector<1x32xf32> to vector<8x32xf32>
    %449 = arith.mulf %448, %364 : vector<8x32xf32>
    %450 = vector.broadcast %15 : vector<1x32xf32> to vector<8x32xf32>
    %451 = arith.mulf %450, %383 : vector<8x32xf32>
    %452 = arith.addf %449, %451 : vector<8x32xf32>
    %cst_146 = arith.constant 1.800000e+00 : f32
    %453 = vector.broadcast %cst_146 : f32 to vector<8x32xf32>
    %454 = arith.mulf %453, %452 : vector<8x32xf32>
    %cst_147 = arith.constant 0.00999999977 : f32
    %455 = vector.broadcast %cst_147 : f32 to vector<8x32xf32>
    %456 = arith.addf %455, %454 : vector<8x32xf32>
    %457 = vector.broadcast %cst_40 : f32 to vector<8x32xf32>
    %458 = arith.mulf %378, %457 : vector<8x32xf32>
    %cst_148 = arith.constant 1.000000e+00 : f32
    %459 = arith.mulf %cst_41, %cst_148 : f32
    %460 = vector.broadcast %459 : f32 to vector<8x32xf32>
    %461 = arith.mulf %460, %447 : vector<8x32xf32>
    %462 = arith.addf %458, %461 : vector<8x32xf32>
    %463 = arith.mulf %456, %383 : vector<8x32xf32>
    %cst_149 = arith.constant 1.000000e+00 : f32
    %464 = vector.broadcast %cst_149 : f32 to vector<8x32xf32>
    %465 = arith.mulf %463, %464 : vector<8x32xf32>
    %466 = arith.subf %462, %465 : vector<8x32xf32>
    %467 = arith.subf %466, %456 : vector<8x32xf32>
    %cst_150 = arith.constant 0.000000e+00 : f32
    %468 = vector.broadcast %cst_150 : f32 to vector<8x32xf32>
    %469 = arith.cmpf ogt, %467, %468 : vector<8x32xf32>
    %470 = arith.extui %469 : vector<8x32xi1> to vector<8x32xi32>
    %471 = arith.sitofp %470 : vector<8x32xi32> to vector<8x32xf32>
    %472 = arith.addf %384, %471 : vector<8x32xf32>
    %c5_i32 = arith.constant 5 : i32
    %c8_i32_151 = arith.constant 8 : i32
    %473 = arith.muli %c5_i32, %c8_i32_151 : i32
    %474 = arith.index_cast %473 : i32 to index
    %c0_152 = arith.constant 0 : index
    %475 = vector.load %arg16[%474, %c0_152] : memref<64x32xf32, #tpu.memory_space<vmem>>, vector<8x32xf32>
    %cst_153 = arith.constant dense<0.000000e+00> : vector<8x32xf32>
    %476 = tpu.matmul %413, %0, %cst_153 {dimension_numbers = #tpu.dot_dimension_numbers<[1], [0], [0], [1], [0, 0, 1, 1], [], []>} : vector<8x32xf32>, vector<32x32xf32>, vector<8x32xf32> -> vector<8x32xf32>
    %477 = arith.addf %475, %476 : vector<8x32xf32>
    %478 = vector.broadcast %7 : vector<1x32xf32> to vector<8x32xf32>
    %479 = arith.mulf %478, %394 : vector<8x32xf32>
    %480 = vector.broadcast %9 : vector<1x32xf32> to vector<8x32xf32>
    %481 = arith.mulf %480, %413 : vector<8x32xf32>
    %482 = arith.addf %479, %481 : vector<8x32xf32>
    %cst_154 = arith.constant 1.800000e+00 : f32
    %483 = vector.broadcast %cst_154 : f32 to vector<8x32xf32>
    %484 = arith.mulf %483, %482 : vector<8x32xf32>
    %cst_155 = arith.constant 0.00999999977 : f32
    %485 = vector.broadcast %cst_155 : f32 to vector<8x32xf32>
    %486 = arith.addf %485, %484 : vector<8x32xf32>
    %487 = vector.broadcast %cst_40 : f32 to vector<8x32xf32>
    %488 = arith.mulf %408, %487 : vector<8x32xf32>
    %cst_156 = arith.constant 1.000000e+00 : f32
    %489 = arith.mulf %cst_41, %cst_156 : f32
    %490 = vector.broadcast %489 : f32 to vector<8x32xf32>
    %491 = arith.mulf %490, %477 : vector<8x32xf32>
    %492 = arith.addf %488, %491 : vector<8x32xf32>
    %493 = arith.mulf %486, %413 : vector<8x32xf32>
    %cst_157 = arith.constant 1.000000e+00 : f32
    %494 = vector.broadcast %cst_157 : f32 to vector<8x32xf32>
    %495 = arith.mulf %493, %494 : vector<8x32xf32>
    %496 = arith.subf %492, %495 : vector<8x32xf32>
    %497 = arith.subf %496, %486 : vector<8x32xf32>
    %cst_158 = arith.constant 0.000000e+00 : f32
    %498 = vector.broadcast %cst_158 : f32 to vector<8x32xf32>
    %499 = arith.cmpf ogt, %497, %498 : vector<8x32xf32>
    %500 = arith.extui %499 : vector<8x32xi1> to vector<8x32xi32>
    %501 = arith.sitofp %500 : vector<8x32xi32> to vector<8x32xf32>
    %cst_159 = arith.constant dense<0.000000e+00> : vector<8x32xf32>
    %502 = tpu.matmul %501, %1, %cst_159 {dimension_numbers = #tpu.dot_dimension_numbers<[1], [0], [0], [1], [0, 0, 1, 1], [], []>} : vector<8x32xf32>, vector<32x32xf32>, vector<8x32xf32> -> vector<8x32xf32>
    %cst_160 = arith.constant dense<0.000000e+00> : vector<8x32xf32>
    %503 = tpu.matmul %442, %2, %cst_160 {dimension_numbers = #tpu.dot_dimension_numbers<[1], [0], [0], [1], [0, 0, 1, 1], [], []>} : vector<8x32xf32>, vector<32x32xf32>, vector<8x32xf32> -> vector<8x32xf32>
    %504 = arith.addf %502, %503 : vector<8x32xf32>
    %505 = vector.broadcast %3 : vector<1x32xf32> to vector<8x32xf32>
    %506 = arith.addf %504, %505 : vector<8x32xf32>
    %507 = vector.broadcast %10 : vector<1x32xf32> to vector<8x32xf32>
    %508 = arith.mulf %507, %423 : vector<8x32xf32>
    %509 = vector.broadcast %12 : vector<1x32xf32> to vector<8x32xf32>
    %510 = arith.mulf %509, %442 : vector<8x32xf32>
    %511 = arith.addf %508, %510 : vector<8x32xf32>
    %cst_161 = arith.constant 1.800000e+00 : f32
    %512 = vector.broadcast %cst_161 : f32 to vector<8x32xf32>
    %513 = arith.mulf %512, %511 : vector<8x32xf32>
    %cst_162 = arith.constant 0.00999999977 : f32
    %514 = vector.broadcast %cst_162 : f32 to vector<8x32xf32>
    %515 = arith.addf %514, %513 : vector<8x32xf32>
    %516 = vector.broadcast %cst_40 : f32 to vector<8x32xf32>
    %517 = arith.mulf %437, %516 : vector<8x32xf32>
    %cst_163 = arith.constant 1.000000e+00 : f32
    %518 = arith.mulf %cst_41, %cst_163 : f32
    %519 = vector.broadcast %518 : f32 to vector<8x32xf32>
    %520 = arith.mulf %519, %506 : vector<8x32xf32>
    %521 = arith.addf %517, %520 : vector<8x32xf32>
    %522 = arith.mulf %515, %442 : vector<8x32xf32>
    %cst_164 = arith.constant 1.000000e+00 : f32
    %523 = vector.broadcast %cst_164 : f32 to vector<8x32xf32>
    %524 = arith.mulf %522, %523 : vector<8x32xf32>
    %525 = arith.subf %521, %524 : vector<8x32xf32>
    %526 = arith.subf %525, %515 : vector<8x32xf32>
    %cst_165 = arith.constant 0.000000e+00 : f32
    %527 = vector.broadcast %cst_165 : f32 to vector<8x32xf32>
    %528 = arith.cmpf ogt, %526, %527 : vector<8x32xf32>
    %529 = arith.extui %528 : vector<8x32xi1> to vector<8x32xi32>
    %530 = arith.sitofp %529 : vector<8x32xi32> to vector<8x32xf32>
    %cst_166 = arith.constant dense<0.000000e+00> : vector<8x32xf32>
    %531 = tpu.matmul %530, %4, %cst_166 {dimension_numbers = #tpu.dot_dimension_numbers<[1], [0], [0], [1], [0, 0, 1, 1], [], []>} : vector<8x32xf32>, vector<32x32xf32>, vector<8x32xf32> -> vector<8x32xf32>
    %cst_167 = arith.constant dense<0.000000e+00> : vector<8x32xf32>
    %532 = tpu.matmul %471, %5, %cst_167 {dimension_numbers = #tpu.dot_dimension_numbers<[1], [0], [0], [1], [0, 0, 1, 1], [], []>} : vector<8x32xf32>, vector<32x32xf32>, vector<8x32xf32> -> vector<8x32xf32>
    %533 = arith.addf %531, %532 : vector<8x32xf32>
    %534 = vector.broadcast %6 : vector<1x32xf32> to vector<8x32xf32>
    %535 = arith.addf %533, %534 : vector<8x32xf32>
    %536 = vector.broadcast %13 : vector<1x32xf32> to vector<8x32xf32>
    %537 = arith.mulf %536, %452 : vector<8x32xf32>
    %538 = vector.broadcast %15 : vector<1x32xf32> to vector<8x32xf32>
    %539 = arith.mulf %538, %471 : vector<8x32xf32>
    %540 = arith.addf %537, %539 : vector<8x32xf32>
    %cst_168 = arith.constant 1.800000e+00 : f32
    %541 = vector.broadcast %cst_168 : f32 to vector<8x32xf32>
    %542 = arith.mulf %541, %540 : vector<8x32xf32>
    %cst_169 = arith.constant 0.00999999977 : f32
    %543 = vector.broadcast %cst_169 : f32 to vector<8x32xf32>
    %544 = arith.addf %543, %542 : vector<8x32xf32>
    %545 = vector.broadcast %cst_40 : f32 to vector<8x32xf32>
    %546 = arith.mulf %466, %545 : vector<8x32xf32>
    %cst_170 = arith.constant 1.000000e+00 : f32
    %547 = arith.mulf %cst_41, %cst_170 : f32
    %548 = vector.broadcast %547 : f32 to vector<8x32xf32>
    %549 = arith.mulf %548, %535 : vector<8x32xf32>
    %550 = arith.addf %546, %549 : vector<8x32xf32>
    %551 = arith.mulf %544, %471 : vector<8x32xf32>
    %cst_171 = arith.constant 1.000000e+00 : f32
    %552 = vector.broadcast %cst_171 : f32 to vector<8x32xf32>
    %553 = arith.mulf %551, %552 : vector<8x32xf32>
    %554 = arith.subf %550, %553 : vector<8x32xf32>
    %555 = arith.subf %554, %544 : vector<8x32xf32>
    %cst_172 = arith.constant 0.000000e+00 : f32
    %556 = vector.broadcast %cst_172 : f32 to vector<8x32xf32>
    %557 = arith.cmpf ogt, %555, %556 : vector<8x32xf32>
    %558 = arith.extui %557 : vector<8x32xi1> to vector<8x32xi32>
    %559 = arith.sitofp %558 : vector<8x32xi32> to vector<8x32xf32>
    %560 = arith.addf %472, %559 : vector<8x32xf32>
    %c6_i32 = arith.constant 6 : i32
    %c8_i32_173 = arith.constant 8 : i32
    %561 = arith.muli %c6_i32, %c8_i32_173 : i32
    %562 = arith.index_cast %561 : i32 to index
    %c0_174 = arith.constant 0 : index
    %563 = vector.load %arg16[%562, %c0_174] : memref<64x32xf32, #tpu.memory_space<vmem>>, vector<8x32xf32>
    %cst_175 = arith.constant dense<0.000000e+00> : vector<8x32xf32>
    %564 = tpu.matmul %501, %0, %cst_175 {dimension_numbers = #tpu.dot_dimension_numbers<[1], [0], [0], [1], [0, 0, 1, 1], [], []>} : vector<8x32xf32>, vector<32x32xf32>, vector<8x32xf32> -> vector<8x32xf32>
    %565 = arith.addf %563, %564 : vector<8x32xf32>
    %566 = vector.broadcast %7 : vector<1x32xf32> to vector<8x32xf32>
    %567 = arith.mulf %566, %482 : vector<8x32xf32>
    %568 = vector.broadcast %9 : vector<1x32xf32> to vector<8x32xf32>
    %569 = arith.mulf %568, %501 : vector<8x32xf32>
    %570 = arith.addf %567, %569 : vector<8x32xf32>
    %cst_176 = arith.constant 1.800000e+00 : f32
    %571 = vector.broadcast %cst_176 : f32 to vector<8x32xf32>
    %572 = arith.mulf %571, %570 : vector<8x32xf32>
    %cst_177 = arith.constant 0.00999999977 : f32
    %573 = vector.broadcast %cst_177 : f32 to vector<8x32xf32>
    %574 = arith.addf %573, %572 : vector<8x32xf32>
    %575 = vector.broadcast %cst_40 : f32 to vector<8x32xf32>
    %576 = arith.mulf %496, %575 : vector<8x32xf32>
    %cst_178 = arith.constant 1.000000e+00 : f32
    %577 = arith.mulf %cst_41, %cst_178 : f32
    %578 = vector.broadcast %577 : f32 to vector<8x32xf32>
    %579 = arith.mulf %578, %565 : vector<8x32xf32>
    %580 = arith.addf %576, %579 : vector<8x32xf32>
    %581 = arith.mulf %574, %501 : vector<8x32xf32>
    %cst_179 = arith.constant 1.000000e+00 : f32
    %582 = vector.broadcast %cst_179 : f32 to vector<8x32xf32>
    %583 = arith.mulf %581, %582 : vector<8x32xf32>
    %584 = arith.subf %580, %583 : vector<8x32xf32>
    %585 = arith.subf %584, %574 : vector<8x32xf32>
    %cst_180 = arith.constant 0.000000e+00 : f32
    %586 = vector.broadcast %cst_180 : f32 to vector<8x32xf32>
    %587 = arith.cmpf ogt, %585, %586 : vector<8x32xf32>
    %588 = arith.extui %587 : vector<8x32xi1> to vector<8x32xi32>
    %589 = arith.sitofp %588 : vector<8x32xi32> to vector<8x32xf32>
    %cst_181 = arith.constant dense<0.000000e+00> : vector<8x32xf32>
    %590 = tpu.matmul %589, %1, %cst_181 {dimension_numbers = #tpu.dot_dimension_numbers<[1], [0], [0], [1], [0, 0, 1, 1], [], []>} : vector<8x32xf32>, vector<32x32xf32>, vector<8x32xf32> -> vector<8x32xf32>
    %cst_182 = arith.constant dense<0.000000e+00> : vector<8x32xf32>
    %591 = tpu.matmul %530, %2, %cst_182 {dimension_numbers = #tpu.dot_dimension_numbers<[1], [0], [0], [1], [0, 0, 1, 1], [], []>} : vector<8x32xf32>, vector<32x32xf32>, vector<8x32xf32> -> vector<8x32xf32>
    %592 = arith.addf %590, %591 : vector<8x32xf32>
    %593 = vector.broadcast %3 : vector<1x32xf32> to vector<8x32xf32>
    %594 = arith.addf %592, %593 : vector<8x32xf32>
    %595 = vector.broadcast %10 : vector<1x32xf32> to vector<8x32xf32>
    %596 = arith.mulf %595, %511 : vector<8x32xf32>
    %597 = vector.broadcast %12 : vector<1x32xf32> to vector<8x32xf32>
    %598 = arith.mulf %597, %530 : vector<8x32xf32>
    %599 = arith.addf %596, %598 : vector<8x32xf32>
    %cst_183 = arith.constant 1.800000e+00 : f32
    %600 = vector.broadcast %cst_183 : f32 to vector<8x32xf32>
    %601 = arith.mulf %600, %599 : vector<8x32xf32>
    %cst_184 = arith.constant 0.00999999977 : f32
    %602 = vector.broadcast %cst_184 : f32 to vector<8x32xf32>
    %603 = arith.addf %602, %601 : vector<8x32xf32>
    %604 = vector.broadcast %cst_40 : f32 to vector<8x32xf32>
    %605 = arith.mulf %525, %604 : vector<8x32xf32>
    %cst_185 = arith.constant 1.000000e+00 : f32
    %606 = arith.mulf %cst_41, %cst_185 : f32
    %607 = vector.broadcast %606 : f32 to vector<8x32xf32>
    %608 = arith.mulf %607, %594 : vector<8x32xf32>
    %609 = arith.addf %605, %608 : vector<8x32xf32>
    %610 = arith.mulf %603, %530 : vector<8x32xf32>
    %cst_186 = arith.constant 1.000000e+00 : f32
    %611 = vector.broadcast %cst_186 : f32 to vector<8x32xf32>
    %612 = arith.mulf %610, %611 : vector<8x32xf32>
    %613 = arith.subf %609, %612 : vector<8x32xf32>
    %614 = arith.subf %613, %603 : vector<8x32xf32>
    %cst_187 = arith.constant 0.000000e+00 : f32
    %615 = vector.broadcast %cst_187 : f32 to vector<8x32xf32>
    %616 = arith.cmpf ogt, %614, %615 : vector<8x32xf32>
    %617 = arith.extui %616 : vector<8x32xi1> to vector<8x32xi32>
    %618 = arith.sitofp %617 : vector<8x32xi32> to vector<8x32xf32>
    %cst_188 = arith.constant dense<0.000000e+00> : vector<8x32xf32>
    %619 = tpu.matmul %618, %4, %cst_188 {dimension_numbers = #tpu.dot_dimension_numbers<[1], [0], [0], [1], [0, 0, 1, 1], [], []>} : vector<8x32xf32>, vector<32x32xf32>, vector<8x32xf32> -> vector<8x32xf32>
    %cst_189 = arith.constant dense<0.000000e+00> : vector<8x32xf32>
    %620 = tpu.matmul %559, %5, %cst_189 {dimension_numbers = #tpu.dot_dimension_numbers<[1], [0], [0], [1], [0, 0, 1, 1], [], []>} : vector<8x32xf32>, vector<32x32xf32>, vector<8x32xf32> -> vector<8x32xf32>
    %621 = arith.addf %619, %620 : vector<8x32xf32>
    %622 = vector.broadcast %6 : vector<1x32xf32> to vector<8x32xf32>
    %623 = arith.addf %621, %622 : vector<8x32xf32>
    %624 = vector.broadcast %13 : vector<1x32xf32> to vector<8x32xf32>
    %625 = arith.mulf %624, %540 : vector<8x32xf32>
    %626 = vector.broadcast %15 : vector<1x32xf32> to vector<8x32xf32>
    %627 = arith.mulf %626, %559 : vector<8x32xf32>
    %628 = arith.addf %625, %627 : vector<8x32xf32>
    %cst_190 = arith.constant 1.800000e+00 : f32
    %629 = vector.broadcast %cst_190 : f32 to vector<8x32xf32>
    %630 = arith.mulf %629, %628 : vector<8x32xf32>
    %cst_191 = arith.constant 0.00999999977 : f32
    %631 = vector.broadcast %cst_191 : f32 to vector<8x32xf32>
    %632 = arith.addf %631, %630 : vector<8x32xf32>
    %633 = vector.broadcast %cst_40 : f32 to vector<8x32xf32>
    %634 = arith.mulf %554, %633 : vector<8x32xf32>
    %cst_192 = arith.constant 1.000000e+00 : f32
    %635 = arith.mulf %cst_41, %cst_192 : f32
    %636 = vector.broadcast %635 : f32 to vector<8x32xf32>
    %637 = arith.mulf %636, %623 : vector<8x32xf32>
    %638 = arith.addf %634, %637 : vector<8x32xf32>
    %639 = arith.mulf %632, %559 : vector<8x32xf32>
    %cst_193 = arith.constant 1.000000e+00 : f32
    %640 = vector.broadcast %cst_193 : f32 to vector<8x32xf32>
    %641 = arith.mulf %639, %640 : vector<8x32xf32>
    %642 = arith.subf %638, %641 : vector<8x32xf32>
    %643 = arith.subf %642, %632 : vector<8x32xf32>
    %cst_194 = arith.constant 0.000000e+00 : f32
    %644 = vector.broadcast %cst_194 : f32 to vector<8x32xf32>
    %645 = arith.cmpf ogt, %643, %644 : vector<8x32xf32>
    %646 = arith.extui %645 : vector<8x32xi1> to vector<8x32xi32>
    %647 = arith.sitofp %646 : vector<8x32xi32> to vector<8x32xf32>
    %648 = arith.addf %560, %647 : vector<8x32xf32>
    %c7_i32 = arith.constant 7 : i32
    %c8_i32_195 = arith.constant 8 : i32
    %649 = arith.muli %c7_i32, %c8_i32_195 : i32
    %650 = arith.index_cast %649 : i32 to index
    %c0_196 = arith.constant 0 : index
    %651 = vector.load %arg16[%650, %c0_196] : memref<64x32xf32, #tpu.memory_space<vmem>>, vector<8x32xf32>
    %cst_197 = arith.constant dense<0.000000e+00> : vector<8x32xf32>
    %652 = tpu.matmul %589, %0, %cst_197 {dimension_numbers = #tpu.dot_dimension_numbers<[1], [0], [0], [1], [0, 0, 1, 1], [], []>} : vector<8x32xf32>, vector<32x32xf32>, vector<8x32xf32> -> vector<8x32xf32>
    %653 = arith.addf %651, %652 : vector<8x32xf32>
    %654 = vector.broadcast %7 : vector<1x32xf32> to vector<8x32xf32>
    %655 = arith.mulf %654, %570 : vector<8x32xf32>
    %656 = vector.broadcast %9 : vector<1x32xf32> to vector<8x32xf32>
    %657 = arith.mulf %656, %589 : vector<8x32xf32>
    %658 = arith.addf %655, %657 : vector<8x32xf32>
    %cst_198 = arith.constant 1.800000e+00 : f32
    %659 = vector.broadcast %cst_198 : f32 to vector<8x32xf32>
    %660 = arith.mulf %659, %658 : vector<8x32xf32>
    %cst_199 = arith.constant 0.00999999977 : f32
    %661 = vector.broadcast %cst_199 : f32 to vector<8x32xf32>
    %662 = arith.addf %661, %660 : vector<8x32xf32>
    %663 = vector.broadcast %cst_40 : f32 to vector<8x32xf32>
    %664 = arith.mulf %584, %663 : vector<8x32xf32>
    %cst_200 = arith.constant 1.000000e+00 : f32
    %665 = arith.mulf %cst_41, %cst_200 : f32
    %666 = vector.broadcast %665 : f32 to vector<8x32xf32>
    %667 = arith.mulf %666, %653 : vector<8x32xf32>
    %668 = arith.addf %664, %667 : vector<8x32xf32>
    %669 = arith.mulf %662, %589 : vector<8x32xf32>
    %cst_201 = arith.constant 1.000000e+00 : f32
    %670 = vector.broadcast %cst_201 : f32 to vector<8x32xf32>
    %671 = arith.mulf %669, %670 : vector<8x32xf32>
    %672 = arith.subf %668, %671 : vector<8x32xf32>
    %673 = arith.subf %672, %662 : vector<8x32xf32>
    %cst_202 = arith.constant 0.000000e+00 : f32
    %674 = vector.broadcast %cst_202 : f32 to vector<8x32xf32>
    %675 = arith.cmpf ogt, %673, %674 : vector<8x32xf32>
    %676 = arith.extui %675 : vector<8x32xi1> to vector<8x32xi32>
    %677 = arith.sitofp %676 : vector<8x32xi32> to vector<8x32xf32>
    %cst_203 = arith.constant dense<0.000000e+00> : vector<8x32xf32>
    %678 = tpu.matmul %677, %1, %cst_203 {dimension_numbers = #tpu.dot_dimension_numbers<[1], [0], [0], [1], [0, 0, 1, 1], [], []>} : vector<8x32xf32>, vector<32x32xf32>, vector<8x32xf32> -> vector<8x32xf32>
    %cst_204 = arith.constant dense<0.000000e+00> : vector<8x32xf32>
    %679 = tpu.matmul %618, %2, %cst_204 {dimension_numbers = #tpu.dot_dimension_numbers<[1], [0], [0], [1], [0, 0, 1, 1], [], []>} : vector<8x32xf32>, vector<32x32xf32>, vector<8x32xf32> -> vector<8x32xf32>
    %680 = arith.addf %678, %679 : vector<8x32xf32>
    %681 = vector.broadcast %3 : vector<1x32xf32> to vector<8x32xf32>
    %682 = arith.addf %680, %681 : vector<8x32xf32>
    %683 = vector.broadcast %10 : vector<1x32xf32> to vector<8x32xf32>
    %684 = arith.mulf %683, %599 : vector<8x32xf32>
    %685 = vector.broadcast %12 : vector<1x32xf32> to vector<8x32xf32>
    %686 = arith.mulf %685, %618 : vector<8x32xf32>
    %687 = arith.addf %684, %686 : vector<8x32xf32>
    %cst_205 = arith.constant 1.800000e+00 : f32
    %688 = vector.broadcast %cst_205 : f32 to vector<8x32xf32>
    %689 = arith.mulf %688, %687 : vector<8x32xf32>
    %cst_206 = arith.constant 0.00999999977 : f32
    %690 = vector.broadcast %cst_206 : f32 to vector<8x32xf32>
    %691 = arith.addf %690, %689 : vector<8x32xf32>
    %692 = vector.broadcast %cst_40 : f32 to vector<8x32xf32>
    %693 = arith.mulf %613, %692 : vector<8x32xf32>
    %cst_207 = arith.constant 1.000000e+00 : f32
    %694 = arith.mulf %cst_41, %cst_207 : f32
    %695 = vector.broadcast %694 : f32 to vector<8x32xf32>
    %696 = arith.mulf %695, %682 : vector<8x32xf32>
    %697 = arith.addf %693, %696 : vector<8x32xf32>
    %698 = arith.mulf %691, %618 : vector<8x32xf32>
    %cst_208 = arith.constant 1.000000e+00 : f32
    %699 = vector.broadcast %cst_208 : f32 to vector<8x32xf32>
    %700 = arith.mulf %698, %699 : vector<8x32xf32>
    %701 = arith.subf %697, %700 : vector<8x32xf32>
    %702 = arith.subf %701, %691 : vector<8x32xf32>
    %cst_209 = arith.constant 0.000000e+00 : f32
    %703 = vector.broadcast %cst_209 : f32 to vector<8x32xf32>
    %704 = arith.cmpf ogt, %702, %703 : vector<8x32xf32>
    %705 = arith.extui %704 : vector<8x32xi1> to vector<8x32xi32>
    %706 = arith.sitofp %705 : vector<8x32xi32> to vector<8x32xf32>
    %cst_210 = arith.constant dense<0.000000e+00> : vector<8x32xf32>
    %707 = tpu.matmul %706, %4, %cst_210 {dimension_numbers = #tpu.dot_dimension_numbers<[1], [0], [0], [1], [0, 0, 1, 1], [], []>} : vector<8x32xf32>, vector<32x32xf32>, vector<8x32xf32> -> vector<8x32xf32>
    %cst_211 = arith.constant dense<0.000000e+00> : vector<8x32xf32>
    %708 = tpu.matmul %647, %5, %cst_211 {dimension_numbers = #tpu.dot_dimension_numbers<[1], [0], [0], [1], [0, 0, 1, 1], [], []>} : vector<8x32xf32>, vector<32x32xf32>, vector<8x32xf32> -> vector<8x32xf32>
    %709 = arith.addf %707, %708 : vector<8x32xf32>
    %710 = vector.broadcast %6 : vector<1x32xf32> to vector<8x32xf32>
    %711 = arith.addf %709, %710 : vector<8x32xf32>
    %712 = vector.broadcast %13 : vector<1x32xf32> to vector<8x32xf32>
    %713 = arith.mulf %712, %628 : vector<8x32xf32>
    %714 = vector.broadcast %15 : vector<1x32xf32> to vector<8x32xf32>
    %715 = arith.mulf %714, %647 : vector<8x32xf32>
    %716 = arith.addf %713, %715 : vector<8x32xf32>
    %cst_212 = arith.constant 1.800000e+00 : f32
    %717 = vector.broadcast %cst_212 : f32 to vector<8x32xf32>
    %718 = arith.mulf %717, %716 : vector<8x32xf32>
    %cst_213 = arith.constant 0.00999999977 : f32
    %719 = vector.broadcast %cst_213 : f32 to vector<8x32xf32>
    %720 = arith.addf %719, %718 : vector<8x32xf32>
    %721 = vector.broadcast %cst_40 : f32 to vector<8x32xf32>
    %722 = arith.mulf %642, %721 : vector<8x32xf32>
    %cst_214 = arith.constant 1.000000e+00 : f32
    %723 = arith.mulf %cst_41, %cst_214 : f32
    %724 = vector.broadcast %723 : f32 to vector<8x32xf32>
    %725 = arith.mulf %724, %711 : vector<8x32xf32>
    %726 = arith.addf %722, %725 : vector<8x32xf32>
    %727 = arith.mulf %720, %647 : vector<8x32xf32>
    %cst_215 = arith.constant 1.000000e+00 : f32
    %728 = vector.broadcast %cst_215 : f32 to vector<8x32xf32>
    %729 = arith.mulf %727, %728 : vector<8x32xf32>
    %730 = arith.subf %726, %729 : vector<8x32xf32>
    %731 = arith.subf %730, %720 : vector<8x32xf32>
    %cst_216 = arith.constant 0.000000e+00 : f32
    %732 = vector.broadcast %cst_216 : f32 to vector<8x32xf32>
    %733 = arith.cmpf ogt, %731, %732 : vector<8x32xf32>
    %734 = arith.extui %733 : vector<8x32xi1> to vector<8x32xi32>
    %735 = arith.sitofp %734 : vector<8x32xi32> to vector<8x32xf32>
    %736 = arith.addf %648, %735 : vector<8x32xf32>
    %c8_i32_217 = arith.constant 8 : i32
    %c0_218 = arith.constant 0 : index
    %c0_219 = arith.constant 0 : index
    %737 = vector.load %arg10[%c0_218, %c0_219] : memref<32x128xf32, #tpu.memory_space<vmem>>, vector<32x128xf32>
    %cst_220 = arith.constant dense<0.000000e+00> : vector<8x128xf32>
    %738 = tpu.matmul %736, %737, %cst_220 {dimension_numbers = #tpu.dot_dimension_numbers<[1], [0], [0], [1], [0, 0, 1, 1], [], []>} : vector<8x32xf32>, vector<32x128xf32>, vector<8x128xf32> -> vector<8x128xf32>
    %c0_221 = arith.constant 0 : index
    %c0_222 = arith.constant 0 : index
    %739 = vector.load %arg11[%c0_221, %c0_222] : memref<1x128xf32, #tpu.memory_space<vmem>>, vector<1x128xf32>
    %cst_223 = arith.constant 8.000000e+00 : f32
    %740 = vector.broadcast %cst_223 : f32 to vector<1x128xf32>
    %741 = arith.mulf %740, %739 : vector<1x128xf32>
    %742 = vector.broadcast %741 : vector<1x128xf32> to vector<8x128xf32>
    %743 = arith.addf %738, %742 : vector<8x128xf32>
    %c0_224 = arith.constant 0 : index
    %c0_225 = arith.constant 0 : index
    %744 = vector.load %arg15[%c0_224, %c0_225] : memref<8x128xf32, #tpu.memory_space<vmem>>, vector<8x128xf32>
    tpu.vector_store %arg15[%c0_224, %c0_225], %743 {strides = array<i32>} : memref<8x128xf32, #tpu.memory_space<vmem>>, vector<8x128xf32>,
    return
  }
}

</mosaic_0001>

<bundles_post_ra>
// kernel: tpu_custom_call.1
= control target key start
LH: loop header
LB: loop body
LE: loop exit
PB: predicated region body
PF: predicated region fallthrough
CT: control target
= control target key end

     0   :  { %20 = vsyncpa [#allocation4], 0  ;;  %s5748_s0 = inlined_call_operand.vmem [shape: f32[64,128], index: 0, kind: input, shape index: {}]   ;;  %s5749_s1 = inlined_call_operand.vmem [shape: f32[128,32], index: 1, kind: input, shape index: {}]   ;;  %s5750_s2 = inlined_call_operand.vmem [shape: f32[1,32], index: 2, kind: input, shape index: {}]   ;;  %s5751_s3 = inlined_call_operand.vmem [shape: f32[32,32], index: 3, kind: input, shape index: {}]   ;;  %s5752_s4 = inlined_call_operand.vmem [shape: f32[32,32], index: 4, kind: input, shape index: {}]   ;;  %s5753_s5 = inlined_call_operand.vmem [shape: f32[1,32], index: 5, kind: input, shape index: {}]   ;;  %s5754_s6 = inlined_call_operand.vmem [shape: f32[32,32], index: 6, kind: input, shape index: {}]   ;;  %s5755_s7 = inlined_call_operand.hbm [shape: f32[32,32], index: 7, kind: input, shape index: {}]   ;;  %s5756_s8 = inlined_call_operand.vmem [shape: f32[1,32], index: 8, kind: input, shape index: {}]   ;;  %s5757_s9 = inlined_call_operand.hbm [shape: f32[32,32], index: 9, kind: input, shape index: {}]   ;;  %s5758_s10 = inlined_call_operand.hbm [shape: f32[32,128], index: 10, kind: input, shape index: {}]   ;;  %s5759_s11 = inlined_call_operand.vmem [shape: f32[1,128], index: 11, kind: input, shape index: {}]   ;;  %s5760_s12 = inlined_call_operand.vmem [shape: f32[1,32], index: 12, kind: input, shape index: {}]   ;;  %s5761_s13 = inlined_call_operand.vmem [shape: f32[1,32], index: 13, kind: input, shape index: {}]   ;;  %s5762_s14 = inlined_call_operand.vmem [shape: f32[1,32], index: 14, kind: input, shape index: {}]   ;;  %s5763_s15 = inlined_call_operand.hbm [shape: f32[8,128], index: 15, kind: output, shape index: {}]  }
   0x1   :  { %21 = vsyncpa [#allocation7], 0 }
   0x2   :  { %22 = vsyncpa [#allocation5], 0  ;;  %s4565_s18 = smov [#allocation6]   ;;  %s4566_s20 = smov [#allocation3]  }
   0x3   :  { %s56_s19 = sshll.u32 %s4565_s18, 4  ;;  %s42_s21 = sshll.u32 %s4566_s20, 4  ;;  %s57_s19 = int_to_ptr.vmem [resolvable:$true] %s56_s19  ;;  %s43_s21 = int_to_ptr.vmem [resolvable:$true] %s42_s21 }
   0x4   :  { %s4487_s22 = scalar_lea.vmem %s57_s19, 512  ;;  %p4492_p1 = scmp.lt.s32.totalorder %s57_s19, %s57_s19 }
   0x5   :  { %p4488_p0 = scmp.ne.s32.totalorder %s57_s19, %s4487_s22  ;;  %p4493_p2 = scmp.lt.s32.totalorder %s4487_s22, %s4487_s22 }
   0x7   :  { %p4494_p3 = por %p4493_p2, %p4492_p1 }
   0x9   :  { %p4495_p4 = pnand %p4494_p3, %p4488_p0 }
   0xb   :  { %4498 = shalt.err (!%p4495_p4)
}
   0xc   :  { %s4567_s23 = smov 128   ;;  %s4568_s24 = smov 8  }
   0xd   :  { %62 = dma.hbm_to_vmem [thread:$0]  %s5757_s9, 512, %s57_s19, [#allocation7], %s4567_s23, %s4567_s23, %s4568_s24  }
   0xe   :  { %s4507_s27 = scalar_lea.vmem %s43_s21, 512  ;;  %p4512_p6 = scmp.lt.s32.totalorder %s43_s21, %s43_s21 }
   0xf   :  { %p4508_p5 = scmp.ne.s32.totalorder %s43_s21, %s4507_s27  ;;  %p4513_p7 = scmp.lt.s32.totalorder %s4507_s27, %s4507_s27 }
  0x11   :  { %p4514_p8 = por %p4513_p7, %p4512_p6 }
  0x13   :  { %p4515_p9 = pnand %p4514_p8, %p4508_p5 }
  0x15   :  { %4518 = shalt.err (!%p4515_p9)
}
  0x16   :  { %48 = dma.hbm_to_vmem [thread:$0]  %s5755_s7, 512, %s43_s21, [#allocation4], %s4567_s23, %s4567_s23, %s4568_s24  }
  0x17   :  { %s4569_s30 = smov [#allocation8]  }
  0x18   :  { %s68_s16 = sshll.u32 %s4569_s30, 4  ;;  %s69_s16 = int_to_ptr.vmem [resolvable:$true] %s68_s16 }
  0x19   :  { %s4527_s17 = scalar_lea.vmem %s69_s16, 512  ;;  %p4532_p11 = scmp.lt.s32.totalorder %s69_s16, %s69_s16 }
  0x1a   :  { %p4528_p10 = scmp.ne.s32.totalorder %s69_s16, %s4527_s17  ;;  %p4533_p12 = scmp.lt.s32.totalorder %s4527_s17, %s4527_s17 }
  0x1c   :  { %p4534_p13 = por %p4533_p12, %p4532_p11 }
  0x1e   :  { %p4535_p0 = pnand %p4534_p13, %p4528_p10 }
  0x20   :  { %4538 = shalt.err (!%p4535_p0)
}
  0x21   :  { %74 = dma.hbm_to_vmem [thread:$0]  %s5758_s10, 512, %s69_s16, [#allocation7], %s4567_s23, %s4567_s23, %s4568_s24  }
  0x22   :  { %4559 = dma.done.wait [#allocation4], 512  }
  0x23   :  { %4560 = vsyncadd [#allocation4], 4294966784 }
  0x24   :  { %4561 = dma.done.wait [#allocation7], 1024  }
  0x25   :  { %4562 = vsyncadd [#allocation7], 4294966272  ;;  %v4570_v0 = vmov 0.0   ;;  %vm4571_vm0 = vmmov 0   ;;  %v143_v1 = vld [vmem:[%s5749_s1 + $0x78] sm:$0xff]  ;;  %v142_v2 = vld [vmem:[%s5749_s1 + $0x70] sm:$0xff]  ;;  %v341_v38 = vlaneseq }
  0x26   :  { %3998 = vmatprep.subr.mxu1 %v4570_v0  ;;  %4006 = vmatprep.mubr.msk.f32.mxu1 %vm4571_vm0, %v4570_v0  ;;  %v141_v3 = vld [vmem:[%s5749_s1 + $0x68] sm:$0xff]  ;;  %v140_v4 = vld [vmem:[%s5749_s1 + $0x60] sm:$0xff]  ;;  %v139_v6 = vld [vmem:[%s5749_s1 + $0x58] sm:$0xff]  ;;  %vm256_vm1 = vcmask 261120   ;;  %s4572_s23 = smov [#allocation9]  }
  0x27   :  { %3954 = vmatprep.subr.mxu0 %v143_v1  ;;  %v120_v5 = vld [vmem:[%s5748_s0] sm:$0xff]  ;;  %v4686_v7 = vld [vmem:[%s5751_s3 + $0x18] sm:$0xff]  ;;  %v4691_v8 = vld [vmem:[%s5751_s3 + $0x10] sm:$0xff]  ;;  %v342_v40 = vshrl.u32 %v341_v38, 7  ;;  %s3650_s24 = sshll.u32 %s4572_s23, 4  ;;  %s3651_s24 = int_to_ptr.vmem [resolvable:$true] %s3650_s24 }
  0x28   :  { %3955 = vmatpush3.msra.mxu0 %v143_v1  ;;  %3986 = vmatprep.mubr.f32.mxu0 %v120_v5  ;;  %v138_v9 = vld [vmem:[%s5749_s1 + $0x50] sm:$0xff]  ;;  %v4701_v10 = vld [vmem:[%s5751_s3 + $0x8] sm:$0xff]  ;;  %v4711_v12 = vld [vmem:[%s5751_s3] sm:$0xff]  ;;  %p4544_p2 = scmp.lt.s32.totalorder %s3651_s24, %s3651_s24 }
  0x29   :  { %3956 = vmatprep.subr.mxu0 %v142_v2  ;;  %3999 = vmatpush3.msra.mxu1 %v4686_v7  ;;  %v137_v11 = vld [vmem:[%s5749_s1 + $0x48] sm:$0xff]  ;;  %v136_v13 = vld [vmem:[%s5749_s1 + $0x40] sm:$0xff]  ;;  %v135_v14 = vld [vmem:[%s5749_s1 + $0x38] sm:$0xff]  ;;  %v4841_v43 = vsub.s32 0, %v342_v40 }
  0x2a   :  { %3957 = vmatpush3.msra.mxu0 %v142_v2  ;;  %4000 = vmatprep.subr.mxu1 %v4570_v0  ;;  %v134_v15 = vld [vmem:[%s5749_s1 + $0x30] sm:$0xff]  ;;  %v133_v16 = vld [vmem:[%s5749_s1 + $0x28] sm:$0xff]  ;;  %v132_v17 = vld [vmem:[%s5749_s1 + $0x20] sm:$0xff] }
  0x2b   :  { %3958 = vmatprep.subr.mxu0 %v141_v3  ;;  %4001 = vmatpush3.msra.mxu1 %v4691_v8  ;;  %v131_v18 = vld [vmem:[%s5749_s1 + $0x18] sm:$0xff]  ;;  %v130_v19 = vld [vmem:[%s5749_s1 + $0x10] sm:$0xff]  ;;  %v129_v20 = vld [vmem:[%s5749_s1 + $0x8] sm:$0xff] }
  0x2c   :  { %3959 = vmatpush3.msra.mxu0 %v141_v3  ;;  %4002 = vmatprep.subr.mxu1 %v4570_v0  ;;  %v128_v21 = vld [vmem:[%s5749_s1] sm:$0xff]  ;;  %v121_v22 = vld [vmem:[%s5748_s0 + $0x8] sm:$0xff]  ;;  %v4762_v23 = vld [vmem:[%s5754_s6 + $0x18] sm:$0xff]  ;;  %s4539_s1 = scalar_lea.vmem %s3651_s24, 128 }
  0x2d   :  { %3960 = vmatprep.subr.mxu0 %v140_v4  ;;  %4003 = vmatpush3.msra.mxu1 %v4701_v10  ;;  %v4767_v24 = vld [vmem:[%s5754_s6 + $0x10] sm:$0xff]  ;;  %v123_v26 = vld [vmem:[%s5748_s0 + $0x18] sm:$0xff]  ;;  %v4782_v27 = vld [vmem:[%s5754_s6 + $0x8] sm:$0xff]  ;;  %p4540_p1 = scmp.ne.s32.totalorder %s3651_s24, %s4539_s1  ;;  %p4545_p3 = scmp.lt.s32.totalorder %s4539_s1, %s4539_s1 }
  0x2e   :  { %3961 = vmatpush3.msra.mxu0 %v140_v4  ;;  %4004 = vmatprep.subr.mxu1 %v4570_v0  ;;  %v122_v25 = vld [vmem:[%s5748_s0 + $0x10] sm:$0xff]  ;;  %v4789_v28 = vld [vmem:[%s5754_s6] sm:$0xff]  ;;  %v125_v30 = vld [vmem:[%s5748_s0 + $0x28] sm:$0xff] }
  0x2f   :  { %3962 = vmatprep.subr.mxu0 %v139_v6  ;;  %4005 = vmatpush3.msra.mxu1 %v4711_v12  ;;  %v124_v29 = vld [vmem:[%s5748_s0 + $0x20] sm:$0xff]  ;;  %v4803_v31 = vld [vmem:[%s5752_s4 + $0x18] sm:$0xff]  ;;  %v126_v32 = vld [vmem:[%s5748_s0 + $0x30] sm:$0xff]  ;;  %p4546_p4 = por %p4545_p3, %p4544_p2 }
  0x30   :  { %3963 = vmatpush3.msra.mxu0 %v139_v6  ;;  %4007 = vmatmul.mubr.f32.vlgmr.msra.gmra.mxu1 %v4570_v0  ;;  %v4815_v33 = vld [vmem:[%s5752_s4 + $0x10] sm:$0xff]  ;;  %v127_v34 = vld [vmem:[%s5748_s0 + $0x38] sm:$0xff]  ;;  %v4825_v35 = vld [vmem:[%s5752_s4 + $0x8] sm:$0xff] }
  0x31   :  { %3964 = vmatprep.subr.mxu0 %v138_v9  ;;  %4009 = vmatprep.subr.mxu1 %v4570_v0  ;;  %v4834_v36 = vld [vmem:[%s5752_s4] sm:$0xff]  ;;  %v4860_v63 = vld [vmem:[#allocation6 + $0x18] sm:$0xff]  ;;  %v4866_v3 = vld [vmem:[#allocation6 + $0x10] sm:$0xff]  ;;  %p4547_p5 = pnand %p4546_p4, %p4540_p1 }
  0x32   :  { %3965 = vmatpush3.msra.mxu0 %v138_v9  ;;  %4017 = vmatprep.mubr.msk.f32.mxu1 %vm4571_vm0, %v4570_v0  ;;  %v114_v41 = vld [vmem:[%s5760_s12] sm:$0x1]  ;;  %v4917_v38 = vld [vmem:[#allocation3 + $0x8] sm:$0xff] }
  0x33   :  { %3966 = vmatprep.subr.mxu0 %v137_v11  ;;  %4010 = vmatpush3.msra.mxu1 %v4762_v23  ;;  %v115_v42 = vsub.f32 1.0, %v114_v41  ;;  %v4844_v44 = vrot.slane %v114_v41, %v4841_v43  ;;  %v3660_v48 = vld [vmem:[%s5750_s2] ss:$0 sm:$0xff] }
  0x34   :  { %3967 = vmatpush3.msra.mxu0 %v137_v11  ;;  %4011 = vmatprep.subr.mxu1 %v4570_v0  ;;  %v116_v40 = vld [vmem:[%s5761_s13] sm:$0x1] }
  0x35   :  { %3968 = vmatprep.subr.mxu0 %v136_v13  ;;  %4012 = vmatpush3.msra.mxu1 %v4767_v24  ;;  %v4847_v45 = vrot.slane %v115_v42, %v4841_v43  ;;  %v346_v46 = vmul.f32 0.01, %v4844_v44  ;;  %v117_v41 = vsub.f32 1.0, %v116_v40  ;;  %v4929_v42 = vrot.slane %v116_v40, %v4841_v43 }
  0x36   :  { %3969 = vmatpush3.msra.mxu0 %v136_v13  ;;  %4013 = vmatprep.subr.mxu1 %v4570_v0 }
  0x37   :  { %3970 = vmatprep.subr.mxu0 %v135_v14  ;;  %4014 = vmatpush3.msra.mxu1 %v4782_v27  ;;  %v353_v47 = vmul.f32 0.0, %v4847_v45 }
  0x38   :  { %3971 = vmatpush3.msra.mxu0 %v135_v14  ;;  %4015 = vmatprep.subr.mxu1 %v4570_v0 }
  0x39   :  { %3972 = vmatprep.subr.mxu0 %v134_v15  ;;  %4016 = vmatpush3.msra.mxu1 %v4789_v28  ;;  %v354_v51 = vadd.f32 %v353_v47, %v346_v46  ;;  %v4932_v46 = vrot.slane %v117_v41, %v4841_v43  ;;  %v521_v47 = vmul.f32 0.01, %v4929_v42 }
  0x3a   :  { %3973 = vmatpush3.msra.mxu0 %v134_v15  ;;  %4018 = vmatmul.mubr.f32.vlgmr.msra.gmra.mxu1 %v4570_v0 }
  0x3b   :  { %3974 = vmatprep.subr.mxu0 %v133_v16  ;;  %4020 = vmatprep.subr.mxu1 %v4570_v0  ;;  %v355_v54 = vmul.f32 1.8, %v354_v51  ;;  %v788_v62 = vmul.f32 %v354_v51, %v4844_v44 }
  0x3c   :  { %3975 = vmatpush3.msra.mxu0 %v133_v16  ;;  %4021 = vmatpush3.msra.mxu1 %v4803_v31 }
  0x3d   :  { %3976 = vmatprep.subr.mxu0 %v132_v17  ;;  %4028 = vmatprep.mubr.msk.f32.mxu1 %vm4571_vm0, %v4570_v0  ;;  %v356_v55 = vadd.f32 0.01, %v355_v54 }
  0x3e   :  { %3977 = vmatpush3.msra.mxu0 %v132_v17  ;;  %4022 = vmatprep.subr.mxu1 %v4570_v0 }
  0x3f   :  { %3978 = vmatprep.subr.mxu0 %v131_v18  ;;  %4023 = vmatpush3.msra.mxu1 %v4815_v33  ;;  %v359_v58 = vmul.f32 0.0, %v356_v55 }
  0x40   :  { %3979 = vmatpush3.msra.mxu0 %v131_v18  ;;  %4024 = vmatprep.subr.mxu1 %v4570_v0 }
  0x41   :  { %3980 = vmatprep.subr.mxu0 %v130_v19  ;;  %4025 = vmatpush3.msra.mxu1 %v4825_v35 }
  0x42   :  { %3981 = vmatpush3.msra.mxu0 %v130_v19  ;;  %4026 = vmatprep.subr.mxu1 %v4570_v0 }
  0x43   :  { %3982 = vmatprep.subr.mxu0 %v129_v20  ;;  %4027 = vmatpush3.msra.mxu1 %v4834_v36 }
  0x44   :  { %3983 = vmatpush3.msra.mxu0 %v129_v20  ;;  %4031 = vmatprep.subr.mxu1 %v4570_v0 }
  0x45   :  { %3984 = vmatprep.subr.mxu0 %v128_v21 }
  0x46   :  { %3985 = vmatpush3.msra.mxu0 %v128_v21 }
  0x47   :  { %3987 = vmatmul.mubr.f32.vlgmr.msra.gmra.mxu0 %v121_v22  ;;  %4053 = vmatprep.subr.mxu0 %v4570_v0 }
  0x48   :  { %4054 = vmatpush3.msra.mxu0 %v4686_v7  ;;  %3989 = vmatprep.mubr.f32.mxu0 %v122_v25 }
  0x49   :  { %4055 = vmatprep.subr.mxu0 %v4570_v0 }
  0x4a   :  { %4056 = vmatpush3.msra.mxu0 %v4691_v8 }
  0x4b   :  { %4057 = vmatprep.subr.mxu0 %v4570_v0  ;;  %3990 = vmatmul.mubr.f32.gmra.mxu0 %v123_v26 }
  0x4c   :  { %4058 = vmatpush3.msra.mxu0 %v4701_v10  ;;  %3992 = vmatprep.mubr.f32.mxu0 %v124_v29 }
  0x4d   :  { %4059 = vmatprep.subr.mxu0 %v4570_v0 }
  0x4e   :  { %4060 = vmatpush3.msra.mxu0 %v4711_v12 }
  0x4f   :  { %4075 = vmatprep.subr.mxu0 %v4570_v0  ;;  %3993 = vmatmul.mubr.f32.gmra.mxu0 %v125_v30  ;;  %v4897_v30 = vld [vmem:[#allocation6 + $0x8] sm:$0xff] }
  0x50   :  { %3995 = vmatprep.mubr.f32.mxu0 %v126_v32  ;;  %v4902_v32 = vld [vmem:[#allocation6] sm:$0xff] }
  0x53   :  { %3996 = vmatmul.mubr.f32.gmra.mxu0 %v127_v34  ;;  %v4907_v34 = vld [vmem:[#allocation3 + $0x18] sm:$0xff] }
  0x54   :  { %4061 = vmatprep.mubr.msk.f32.mxu0 %vm4571_vm0, %v4570_v0 }
  0xf0   :  { %v335_v37 = vpop.f32.mrf.mxu1 }
  0xf2   :  { %v4008_v39 = vpop.f32.mrf.mxu1 }
  0xf3   :  { %v4920_v39 = vld [vmem:[#allocation3] sm:$0xff] }
  0xfa   :  { %v431_v16 = vpop.f32.mrf.mxu1 }
  0xfc   :  { %v4019_v19 = vpop.f32.mrf.mxu1 }
 0x107   :  { %v3988_v49 = vpop.f32.mrf.mxu0 }
 0x108   :  { %v223_v50 = vadd.f32 %v3988_v49, %v3660_v48 }
 0x109   :  { %v217_v52 = vpop.f32.mrf.mxu0 }
 0x10a   :  { %258 = vst.msk [vmem:[#allocation2 + $0x8] sm:$0xff] %vm256_vm1, %v223_v50  ;;  %v218_v53 = vadd.f32 %v3660_v48, %v217_v52  ;;  %v4939_v52 = vld [vmem:[%s5753_s5] ss:$0 sm:$0xff] }
 0x10b   :  { %v3991_v11 = vpop.f32.mrf.mxu0 }
 0x10c   :  { %257 = vst.msk [vmem:[#allocation2] sm:$0xff] %vm256_vm1, %v218_v53  ;;  %v233_v13 = vadd.f32 %v3991_v11, %v3660_v48 }
 0x10d   :  { %v227_v14 = vpop.f32.mrf.mxu0 }
 0x10e   :  { %260 = vst.msk [vmem:[#allocation2 + $0x18] sm:$0xff] %vm256_vm1, %v233_v13  ;;  %v228_v15 = vadd.f32 %v3660_v48, %v227_v14 }
 0x10f   :  { %v3994_v17 = vpop.f32.mrf.mxu0 }
 0x110   :  { %259 = vst.msk [vmem:[#allocation2 + $0x10] sm:$0xff] %vm256_vm1, %v228_v15  ;;  %v243_v18 = vadd.f32 %v3994_v17, %v3660_v48 }
 0x111   :  { %v237_v20 = vpop.f32.mrf.mxu0  ;;  %v716_v54 = vld [vmem:[#allocation2 + $0x8] sm:$0xff] }
 0x112   :  { %262 = vst.msk [vmem:[#allocation2 + $0x28] sm:$0xff] %vm256_vm1, %v243_v18  ;;  %v238_v21 = vadd.f32 %v3660_v48, %v237_v20 }
 0x113   :  { %v265_v56 = vld [vmem:[#allocation2] sm:$0xff]  ;;  %v3997_v22 = vpop.f32.mrf.mxu0 }
 0x114   :  { %v339_v57 = vadd.f32 %v335_v37, %v265_v56  ;;  %261 = vst.msk [vmem:[#allocation2 + $0x20] sm:$0xff] %vm256_vm1, %v238_v21  ;;  %v253_v25 = vadd.f32 %v3997_v22, %v3660_v48  ;;  %v4913_v37 = vld [vmem:[#allocation3 + $0x10] sm:$0xff] }
 0x115   :  { %v247_v26 = vpop.f32.mrf.mxu0 }
 0x116   :  { %v357_v59 = vmul.f32 0.048770577, %v339_v57  ;;  %264 = vst.msk [vmem:[#allocation2 + $0x38] sm:$0xff] %vm256_vm1, %v253_v25  ;;  %v248_v29 = vadd.f32 %v3660_v48, %v247_v26  ;;  %v528_v48 = vmul.f32 0.0, %v4932_v46  ;;  %v118_v26 = vld [vmem:[%s5762_s14] sm:$0x1] }
 0x117   :  { %v4998_v40 = vrot.slane %v118_v26, %v4841_v43 }
 0x118   :  { %v4856_v60 = vsub.f32 %v357_v59, %v359_v58  ;;  %263 = vst.msk [vmem:[#allocation2 + $0x30] sm:$0xff] %vm256_vm1, %v248_v29  ;;  %v529_v49 = vadd.f32 %v528_v48, %v521_v47  ;;  %v119_v29 = vsub.f32 1.0, %v118_v26 }
 0x119   :  { %v696_v47 = vmul.f32 0.01, %v4998_v40 }
 0x11a   :  { %v361_v61 = vsub.f32 %v4856_v60, %v356_v55  ;;  %v530_v50 = vmul.f32 1.8, %v529_v49  ;;  %v946_v17 = vmul.f32 %v529_v49, %v4929_v42  ;;  %v5001_v41 = vrot.slane %v119_v29, %v4841_v43 }
 0x11c   :  { %vm362_vm2 = vcmp.gt.f32.partialorder %v361_v61, 0.0  ;;  %v531_v51 = vadd.f32 0.01, %v530_v50  ;;  %v703_v48 = vmul.f32 0.0, %v5001_v41 }
 0x11d   :  { %v3661_v1 = vsel %vm362_vm2, 1.0, %v4570_v0 }
 0x11e   :  { %4029 = vmatmul.mubr.msk.f32.vlgmr.msra.gmra.mxu1 %vm256_vm1, %v3661_v1  ;;  %v789_v2 = vmul.f32 %v3661_v1, %v4847_v45  ;;  %4062 = vmatmul.mubr.msk.f32.vlgmr.msra.gmra.mxu0 %vm256_vm1, %v3661_v1  ;;  %v5005_v49 = vadd.f32 %v703_v48, %v696_v47 }
 0x11f   :  { %4032 = vmatpush3.msra.mxu1 %v4860_v63  ;;  %4039 = vmatprep.mubr.msk.f32.mxu1 %vm4571_vm0, %v4570_v0 }
 0x120   :  { %4033 = vmatprep.subr.mxu1 %v4570_v0  ;;  %v4872_v4 = vadd.f32 %v789_v2, %v788_v62  ;;  %4076 = vmatpush3.msra.mxu0 %v4803_v31  ;;  %v534_v62 = vmul.f32 0.0, %v531_v51  ;;  %v705_v50 = vmul.f32 1.8, %v5005_v49 }
 0x121   :  { %4034 = vmatpush3.msra.mxu1 %v4866_v3  ;;  %4077 = vmatprep.subr.mxu0 %v4570_v0 }
 0x122   :  { %4035 = vmatprep.subr.mxu1 %v4570_v0  ;;  %v791_v5 = vmul.f32 1.8, %v4872_v4  ;;  %4078 = vmatpush3.msra.mxu0 %v4815_v33 }
 0x123   :  { %4079 = vmatprep.subr.mxu0 %v4570_v0  ;;  %4083 = vmatprep.mubr.msk.f32.mxu0 %vm4571_vm0, %v4570_v0 }
 0x124   :  { %v4883_v6 = vadd.f32 0.01, %v791_v5  ;;  %4080 = vmatpush3.msra.mxu0 %v4825_v35  ;;  %4036 = vmatpush3.msra.mxu1 %v4897_v30 }
 0x125   :  { %4081 = vmatprep.subr.mxu0 %v4570_v0  ;;  %4037 = vmatprep.subr.mxu1 %v4570_v0 }
 0x126   :  { %v4888_v9 = vmul.f32 %v3661_v1, %v4883_v6  ;;  %4082 = vmatpush3.msra.mxu0 %v4834_v36  ;;  %4038 = vmatpush3.msra.mxu1 %v4902_v32  ;;  %v793_v1 = vmul.f32 0.95122945, %v4856_v60 }
 0x127   :  { %4097 = vmatprep.subr.mxu0 %v4570_v0  ;;  %4040 = vmatmul.mubr.f32.vlgmr.msra.gmra.mxu1 %v4570_v0 }
 0x128   :  { %4042 = vmatprep.subr.mxu1 %v4570_v0  ;;  %4050 = vmatprep.mubr.msk.f32.mxu1 %vm4571_vm0, %v4570_v0 }
 0x129   :  { %4043 = vmatpush3.msra.mxu1 %v4907_v34 }
 0x12a   :  { %4044 = vmatprep.subr.mxu1 %v4570_v0 }
 0x12b   :  { %4045 = vmatpush3.msra.mxu1 %v4913_v37 }
 0x12c   :  { %4046 = vmatprep.subr.mxu1 %v4570_v0 }
 0x12d   :  { %4047 = vmatpush3.msra.mxu1 %v4917_v38 }
 0x12e   :  { %4048 = vmatprep.subr.mxu1 %v4570_v0 }
 0x12f   :  { %4049 = vmatpush3.msra.mxu1 %v4920_v39 }
 0x130   :  { %4064 = vmatprep.subr.mxu1 %v4570_v0 }
 0x1de   :  { %v504_v53 = vpop.f32.mrf.mxu1  ;;  %v783_v55 = vpop.f32.mrf.mxu0 }
 0x1df   :  { %v505_v56 = vadd.f32 %v504_v53, %v431_v16  ;;  %v787_v57 = vadd.f32 %v783_v55, %v716_v54  ;;  %v5011_v53 = vld [vmem:[%s5756_s8] ss:$0 sm:$0xff] }
 0x1e0   :  { %v4030_v58 = vpop.f32.mrf.mxu1  ;;  %v4063_v59 = vpop.f32.mrf.mxu0 }
 0x1e1   :  { %v514_v61 = vadd.f32 %v4939_v52, %v505_v56  ;;  %v794_v2 = vmul.f32 0.048770577, %v787_v57 }
 0x1e3   :  { %v532_v5 = vmul.f32 0.048770577, %v514_v61  ;;  %v795_v11 = vadd.f32 %v794_v2, %v793_v1 }
 0x1e5   :  { %v4943_v13 = vsub.f32 %v532_v5, %v534_v62  ;;  %v4946_v14 = vsub.f32 %v795_v11, %v4888_v9 }
 0x1e7   :  { %v536_v15 = vsub.f32 %v4943_v13, %v531_v51  ;;  %v798_v16 = vsub.f32 %v4946_v14, %v4883_v6  ;;  %v606_v22 = vpop.f32.mrf.mxu1  ;;  %v706_v51 = vadd.f32 0.01, %v705_v50  ;;  %v1194_v50 = vmul.f32 %v4872_v4, %v4844_v44 }
 0x1e8   :  { %v1199_v4 = vmul.f32 0.95122945, %v4946_v14 }
 0x1e9   :  { %vm537_vm3 = vcmp.gt.f32.partialorder %v536_v15, 0.0  ;;  %vm799_vm4 = vcmp.gt.f32.partialorder %v798_v16, 0.0  ;;  %v4041_v25 = vpop.f32.mrf.mxu1  ;;  %v709_v61 = vmul.f32 0.0, %v706_v51 }
 0x1ea   :  { %v3664_v18 = vsel %vm537_vm3, 1.0, %v4570_v0  ;;  %v4954_v60 = vsel %vm799_vm4, 1.0, %v4570_v0 }
 0x1eb   :  { %4051 = vmatmul.mubr.msk.f32.vlgmr.msra.gmra.mxu1 %vm256_vm1, %v3664_v18  ;;  %v947_v19 = vmul.f32 %v3664_v18, %v4932_v46  ;;  %4084 = vmatmul.mubr.msk.f32.vlgmr.msra.gmra.mxu0 %vm256_vm1, %v4954_v60  ;;  %v1195_v48 = vmul.f32 %v4954_v60, %v4847_v45 }
 0x1ec   :  { %4065 = vmatpush3.msra.mxu1 %v4762_v23  ;;  %4072 = vmatprep.mubr.msk.f32.mxu1 %vm4571_vm0, %v4570_v0 }
 0x1ed   :  { %v4963_v6 = vadd.f32 %v947_v19, %v946_v17  ;;  %4066 = vmatprep.subr.mxu1 %v4570_v0  ;;  %4098 = vmatpush3.msra.mxu0 %v4907_v34 }
 0x1ee   :  { %4067 = vmatpush3.msra.mxu1 %v4767_v24  ;;  %4099 = vmatprep.subr.mxu0 %v4570_v0 }
 0x1ef   :  { %4068 = vmatprep.subr.mxu1 %v4570_v0  ;;  %v949_v9 = vmul.f32 1.8, %v4963_v6  ;;  %4100 = vmatpush3.msra.mxu0 %v4913_v37 }
 0x1f0   :  { %4069 = vmatpush3.msra.mxu1 %v4782_v27  ;;  %4101 = vmatprep.subr.mxu0 %v4570_v0 }
 0x1f1   :  { %4070 = vmatprep.subr.mxu1 %v4570_v0  ;;  %v950_v20 = vadd.f32 0.01, %v949_v9  ;;  %4102 = vmatpush3.msra.mxu0 %v4917_v38 }
 0x1f2   :  { %4071 = vmatpush3.msra.mxu1 %v4789_v28  ;;  %4103 = vmatprep.subr.mxu0 %v4570_v0 }
 0x1f3   :  { %4073 = vmatmul.mubr.msk.f32.vlgmr.msra.gmra.mxu1 %vm256_vm1, %v3664_v18  ;;  %4086 = vmatprep.subr.mxu1 %v4570_v0  ;;  %v954_v21 = vmul.f32 %v3664_v18, %v950_v20  ;;  %v951_v18 = vmul.f32 0.95122945, %v4943_v13 }
 0x1f4   :  { %4087 = vmatpush3.msra.mxu1 %v4860_v63  ;;  %4094 = vmatprep.mubr.msk.f32.mxu1 %vm4571_vm0, %v4570_v0 }
 0x1f5   :  { %4088 = vmatprep.subr.mxu1 %v4570_v0  ;;  %4104 = vmatpush3.msra.mxu0 %v4920_v39 }
 0x1f6   :  { %4089 = vmatpush3.msra.mxu1 %v4866_v3  ;;  %4105 = vmatprep.mubr.msk.f32.mxu0 %vm4571_vm0, %v4570_v0 }
 0x1f7   :  { %4090 = vmatprep.subr.mxu1 %v4570_v0  ;;  %4119 = vmatprep.subr.mxu0 %v4570_v0 }
 0x1f8   :  { %4091 = vmatpush3.msra.mxu1 %v4897_v30 }
 0x1f9   :  { %4092 = vmatprep.subr.mxu1 %v4570_v0 }
 0x1fa   :  { %4093 = vmatpush3.msra.mxu1 %v4902_v32 }
 0x1fb   :  { %4108 = vmatprep.subr.mxu1 %v4570_v0 }
 0x2ab   :  { %v679_v54 = vpop.f32.mrf.mxu1  ;;  %v941_v55 = vpop.f32.mrf.mxu0 }
 0x2ac   :  { %v680_v56 = vadd.f32 %v679_v54, %v606_v22  ;;  %v1107_v54 = vmul.f32 %v5005_v49, %v4998_v40 }
 0x2ad   :  { %v4052_v57 = vpop.f32.mrf.mxu1  ;;  %v4085_v58 = vpop.f32.mrf.mxu0 }
 0x2ae   :  { %v689_v59 = vadd.f32 %v5011_v53, %v680_v56  ;;  %v1196_v56 = vadd.f32 %v1195_v48, %v1194_v50 }
 0x2b0   :  { %v707_v62 = vmul.f32 0.048770577, %v689_v59  ;;  %v1197_v59 = vmul.f32 1.8, %v1196_v56 }
 0x2b2   :  { %v5014_v1 = vsub.f32 %v707_v62, %v709_v61  ;;  %v1122_v61 = vld [vmem:[#allocation2 + $0x10] sm:$0xff] }
 0x2b3   :  { %v868_v2 = vpop.f32.mrf.mxu1 }
 0x2b4   :  { %v711_v5 = vsub.f32 %v5014_v1, %v706_v51  ;;  %v942_v11 = vadd.f32 %v941_v55, %v868_v2 }
 0x2b5   :  { %v4074_v15 = vpop.f32.mrf.mxu1 }
 0x2b6   :  { %v945_v16 = vadd.f32 %v4939_v52, %v942_v11  ;;  %vm712_vm5 = vcmp.gt.f32.partialorder %v711_v5, 0.0  ;;  %v1198_v5 = vadd.f32 0.01, %v1197_v59 }
 0x2b7   :  { %v5019_v17 = vsel %vm712_vm5, 1.0, %v4570_v0 }
 0x2b8   :  { %v952_v19 = vmul.f32 0.048770577, %v945_v16  ;;  %4095 = vmatmul.mubr.msk.f32.vlgmr.msra.gmra.mxu1 %vm256_vm1, %v5019_v17  ;;  %v1108_v55 = vmul.f32 %v5019_v17, %v5001_v41 }
 0x2b9   :  { %4109 = vmatpush3.msra.mxu1 %v4686_v7  ;;  %4116 = vmatprep.mubr.msk.f32.mxu1 %vm4571_vm0, %v4570_v0 }
 0x2ba   :  { %v953_v9 = vadd.f32 %v952_v19, %v951_v18  ;;  %4110 = vmatprep.subr.mxu1 %v4570_v0  ;;  %v1109_v58 = vadd.f32 %v1108_v55, %v1107_v54 }
 0x2bb   :  { %4111 = vmatpush3.msra.mxu1 %v4691_v8 }
 0x2bc   :  { %v5029_v22 = vsub.f32 %v953_v9, %v954_v21  ;;  %4112 = vmatprep.subr.mxu1 %v4570_v0  ;;  %v1110_v11 = vmul.f32 1.8, %v1109_v58 }
 0x2bd   :  { %4113 = vmatpush3.msra.mxu1 %v4701_v10 }
 0x2be   :  { %4114 = vmatprep.subr.mxu1 %v4570_v0  ;;  %v956_v13 = vsub.f32 %v5029_v22, %v950_v20  ;;  %v1352_v20 = vmul.f32 %v4963_v6, %v4929_v42 }
 0x2bf   :  { %4115 = vmatpush3.msra.mxu1 %v4711_v12 }
 0x2c0   :  { %4117 = vmatmul.mubr.msk.f32.vlgmr.msra.gmra.mxu1 %vm256_vm1, %v4954_v60  ;;  %vm957_vm6 = vcmp.gt.f32.partialorder %v956_v13, 0.0  ;;  %4130 = vmatprep.subr.mxu1 %v4570_v0  ;;  %v1202_v13 = vmul.f32 %v4954_v60, %v1198_v5 }
 0x2c1   :  { %v3672_v25 = vsel %vm957_vm6, 1.0, %v4570_v0  ;;  %4131 = vmatpush3.msra.mxu1 %v4803_v31  ;;  %4138 = vmatprep.mubr.msk.f32.mxu1 %vm4571_vm0, %v4570_v0 }
 0x2c2   :  { %4106 = vmatmul.mubr.msk.f32.vlgmr.msra.gmra.mxu0 %vm256_vm1, %v3672_v25  ;;  %v1353_v21 = vmul.f32 %v3672_v25, %v4932_v46  ;;  %4132 = vmatprep.subr.mxu1 %v4570_v0 }
 0x2c3   :  { %4120 = vmatpush3.msra.mxu0 %v4762_v23  ;;  %4127 = vmatprep.mubr.msk.f32.mxu0 %vm4571_vm0, %v4570_v0 }
 0x2c4   :  { %v5051_v26 = vadd.f32 %v1353_v21, %v1352_v20  ;;  %4121 = vmatprep.subr.mxu0 %v4570_v0  ;;  %4133 = vmatpush3.msra.mxu1 %v4815_v33  ;;  %v1111_v20 = vadd.f32 0.01, %v1110_v11 }
 0x2c5   :  { %4122 = vmatpush3.msra.mxu0 %v4767_v24  ;;  %4134 = vmatprep.subr.mxu1 %v4570_v0 }
 0x2c6   :  { %4123 = vmatprep.subr.mxu0 %v4570_v0  ;;  %4135 = vmatpush3.msra.mxu1 %v4825_v35  ;;  %v1355_v6 = vmul.f32 1.8, %v5051_v26  ;;  %v1115_v55 = vmul.f32 %v5019_v17, %v1111_v20 }
 0x2c7   :  { %4124 = vmatpush3.msra.mxu0 %v4782_v27  ;;  %4136 = vmatprep.subr.mxu1 %v4570_v0 }
 0x2c8   :  { %4125 = vmatprep.subr.mxu0 %v4570_v0  ;;  %4137 = vmatpush3.msra.mxu1 %v4834_v36  ;;  %v5064_v29 = vadd.f32 0.01, %v1355_v6  ;;  %v1112_v6 = vmul.f32 0.95122945, %v5014_v1  ;;  %v1600_v1 = vmul.f32 %v1196_v56, %v4844_v44  ;;  %v1513_v56 = vmul.f32 %v1109_v58, %v4998_v40 }
 0x2c9   :  { %4126 = vmatpush3.msra.mxu0 %v4789_v28  ;;  %4152 = vmatprep.subr.mxu1 %v4570_v0 }
 0x2ca   :  { %4128 = vmatmul.mubr.msk.f32.vlgmr.msra.gmra.mxu0 %vm256_vm1, %v3672_v25  ;;  %4141 = vmatprep.subr.mxu0 %v4570_v0  ;;  %v5071_v47 = vmul.f32 %v3672_v25, %v5064_v29 }
 0x2cb   :  { %4142 = vmatpush3.msra.mxu0 %v4860_v63  ;;  %4149 = vmatprep.mubr.msk.f32.mxu0 %vm4571_vm0, %v4570_v0 }
 0x2cc   :  { %4143 = vmatprep.subr.mxu0 %v4570_v0 }
 0x2cd   :  { %4144 = vmatpush3.msra.mxu0 %v4866_v3 }
 0x2ce   :  { %4145 = vmatprep.subr.mxu0 %v4570_v0 }
 0x2cf   :  { %4146 = vmatpush3.msra.mxu0 %v4897_v30 }
 0x2d0   :  { %4147 = vmatprep.subr.mxu0 %v4570_v0 }
 0x2d1   :  { %4148 = vmatpush3.msra.mxu0 %v4902_v32 }
 0x2d2   :  { %4163 = vmatprep.subr.mxu0 %v4570_v0 }
 0x378   :  { %v1029_v51 = vpop.f32.mrf.mxu1 }
 0x37a   :  { %v4096_v57 = vpop.f32.mrf.mxu1 }
 0x380   :  { %v1189_v62 = vpop.f32.mrf.mxu1 }
 0x381   :  { %v1193_v2 = vadd.f32 %v1189_v62, %v1122_v61 }
 0x382   :  { %v1102_v15 = vpop.f32.mrf.mxu0  ;;  %v4118_v16 = vpop.f32.mrf.mxu1 }
 0x383   :  { %v1200_v18 = vmul.f32 0.048770577, %v1193_v2  ;;  %v1103_v19 = vadd.f32 %v1102_v15, %v1029_v51 }
 0x384   :  { %v4107_v9 = vpop.f32.mrf.mxu0 }
 0x385   :  { %v1201_v49 = vadd.f32 %v1200_v18, %v1199_v4  ;;  %v1106_v25 = vadd.f32 %v5011_v53, %v1103_v19 }
 0x387   :  { %v5094_v21 = vsub.f32 %v1201_v49, %v1202_v13  ;;  %v1113_v48 = vmul.f32 0.048770577, %v1106_v25 }
 0x389   :  { %v1204_v50 = vsub.f32 %v5094_v21, %v1198_v5  ;;  %v1114_v54 = vadd.f32 %v1113_v48, %v1112_v6  ;;  %v1357_v6 = vmul.f32 0.95122945, %v5029_v22  ;;  %v1758_v22 = vmul.f32 %v5051_v26, %v4929_v42 }
 0x38a   :  { %v1274_v14 = vpop.f32.mrf.mxu0 }
 0x38b   :  { %v5099_v57 = vsub.f32 %v1114_v54, %v1115_v55  ;;  %vm1205_vm7 = vcmp.gt.f32.partialorder %v1204_v50, 0.0 }
 0x38c   :  { %v4129_v51 = vpop.f32.mrf.mxu0  ;;  %v3677_v60 = vsel %vm1205_vm7, 1.0, %v4570_v0 }
 0x38d   :  { %4139 = vmatmul.mubr.msk.f32.vlgmr.msra.gmra.mxu1 %vm256_vm1, %v3677_v60  ;;  %v1601_v59 = vmul.f32 %v3677_v60, %v4847_v45  ;;  %v1117_v61 = vsub.f32 %v5099_v57, %v1111_v20 }
 0x38e   :  { %4153 = vmatpush3.msra.mxu1 %v4907_v34  ;;  %4160 = vmatprep.mubr.msk.f32.mxu1 %vm4571_vm0, %v4570_v0 }
 0x38f   :  { %vm1118_vm8 = vcmp.gt.f32.partialorder %v1117_v61, 0.0  ;;  %4154 = vmatprep.subr.mxu1 %v4570_v0  ;;  %v5110_v62 = vadd.f32 %v1601_v59, %v1600_v1 }
 0x390   :  { %v5113_v2 = vsel %vm1118_vm8, 1.0, %v4570_v0  ;;  %4155 = vmatpush3.msra.mxu1 %v4913_v37 }
 0x391   :  { %4150 = vmatmul.mubr.msk.f32.vlgmr.msra.gmra.mxu0 %vm256_vm1, %v5113_v2  ;;  %v1514_v5 = vmul.f32 %v5113_v2, %v5001_v41  ;;  %4156 = vmatprep.subr.mxu1 %v4570_v0  ;;  %v1603_v11 = vmul.f32 1.8, %v5110_v62 }
 0x392   :  { %4164 = vmatpush3.msra.mxu0 %v4686_v7  ;;  %4171 = vmatprep.mubr.msk.f32.mxu0 %vm4571_vm0, %v4570_v0 }
 0x393   :  { %v5126_v15 = vadd.f32 %v1514_v5, %v1513_v56  ;;  %4165 = vmatprep.subr.mxu0 %v4570_v0  ;;  %4157 = vmatpush3.msra.mxu1 %v4917_v38  ;;  %v1604_v16 = vadd.f32 0.01, %v1603_v11  ;;  %v1605_v56 = vmul.f32 0.95122945, %v5094_v21 }
 0x394   :  { %4166 = vmatpush3.msra.mxu0 %v4691_v8  ;;  %4158 = vmatprep.subr.mxu1 %v4570_v0 }
 0x395   :  { %4167 = vmatprep.subr.mxu0 %v4570_v0  ;;  %v1608_v58 = vmul.f32 %v3677_v60, %v1604_v16  ;;  %4159 = vmatpush3.msra.mxu1 %v4920_v39  ;;  %v1516_v4 = vmul.f32 1.8, %v5126_v15 }
 0x396   :  { %4168 = vmatpush3.msra.mxu0 %v4701_v10  ;;  %4174 = vmatprep.subr.mxu1 %v4570_v0 }
 0x397   :  { %4169 = vmatprep.subr.mxu0 %v4570_v0  ;;  %v5138_v18 = vadd.f32 0.01, %v1516_v4 }
 0x398   :  { %4170 = vmatpush3.msra.mxu0 %v4711_v12 }
 0x399   :  { %4172 = vmatmul.mubr.msk.f32.vlgmr.msra.gmra.mxu0 %vm256_vm1, %v3677_v60  ;;  %4185 = vmatprep.subr.mxu0 %v4570_v0  ;;  %v5145_v19 = vmul.f32 %v5113_v2, %v5138_v18  ;;  %v1528_v60 = vld [vmem:[#allocation2 + $0x18] sm:$0xff] }
 0x39a   :  { %4186 = vmatpush3.msra.mxu0 %v4803_v31  ;;  %4193 = vmatprep.mubr.msk.f32.mxu0 %vm4571_vm0, %v4570_v0 }
 0x39b   :  { %4187 = vmatprep.subr.mxu0 %v4570_v0 }
 0x39c   :  { %4188 = vmatpush3.msra.mxu0 %v4815_v33 }
 0x39d   :  { %4189 = vmatprep.subr.mxu0 %v4570_v0 }
 0x39e   :  { %4190 = vmatpush3.msra.mxu0 %v4825_v35 }
 0x39f   :  { %4191 = vmatprep.subr.mxu0 %v4570_v0 }
 0x3a0   :  { %4192 = vmatpush3.msra.mxu0 %v4834_v36 }
 0x3a1   :  { %4207 = vmatprep.subr.mxu0 %v4570_v0 }
 0x44d   :  { %v1347_v9 = vpop.f32.mrf.mxu1 }
 0x44e   :  { %v1348_v49 = vadd.f32 %v1347_v9, %v1274_v14 }
 0x44f   :  { %v4140_v13 = vpop.f32.mrf.mxu1 }
 0x450   :  { %v1351_v25 = vadd.f32 %v4939_v52, %v1348_v49 }
 0x451   :  { %v1435_v20 = vpop.f32.mrf.mxu0 }
 0x452   :  { %v1358_v48 = vmul.f32 0.048770577, %v1351_v25 }
 0x453   :  { %v4151_v50 = vpop.f32.mrf.mxu0 }
 0x454   :  { %v1359_v54 = vadd.f32 %v1358_v48, %v1357_v6  ;;  %v1518_v48 = vmul.f32 0.95122945, %v5099_v57 }
 0x456   :  { %v5160_v55 = vsub.f32 %v1359_v54, %v5071_v47 }
 0x458   :  { %v1362_v51 = vsub.f32 %v5160_v55, %v5064_v29 }
 0x459   :  { %v1595_v59 = vpop.f32.mrf.mxu0 }
 0x45a   :  { %v1599_v61 = vadd.f32 %v1595_v59, %v1528_v60  ;;  %vm1363_vm9 = vcmp.gt.f32.partialorder %v1362_v51, 0.0 }
 0x45b   :  { %v4173_v14 = vpop.f32.mrf.mxu0  ;;  %v3680_v1 = vsel %vm1363_vm9, 1.0, %v4570_v0 }
 0x45c   :  { %v1606_v5 = vmul.f32 0.048770577, %v1599_v61  ;;  %4161 = vmatmul.mubr.msk.f32.vlgmr.msra.gmra.mxu1 %vm256_vm1, %v3680_v1  ;;  %v1759_v47 = vmul.f32 %v3680_v1, %v4932_v46 }
 0x45d   :  { %4175 = vmatpush3.msra.mxu1 %v4762_v23  ;;  %4182 = vmatprep.mubr.msk.f32.mxu1 %vm4571_vm0, %v4570_v0 }
 0x45e   :  { %v1607_v29 = vadd.f32 %v1606_v5, %v1605_v56  ;;  %v5173_v11 = vadd.f32 %v1759_v47, %v1758_v22  ;;  %4176 = vmatprep.subr.mxu1 %v4570_v0  ;;  %v1919_v22 = vmul.f32 %v5126_v15, %v4998_v40 }
 0x45f   :  { %4177 = vmatpush3.msra.mxu1 %v4767_v24 }
 0x460   :  { %v5177_v21 = vsub.f32 %v1607_v29, %v1608_v58  ;;  %4178 = vmatprep.subr.mxu1 %v4570_v0  ;;  %v1761_v26 = vmul.f32 1.8, %v5173_v11 }
 0x461   :  { %4179 = vmatpush3.msra.mxu1 %v4782_v27 }
 0x462   :  { %v1610_v4 = vsub.f32 %v5177_v21, %v1604_v16  ;;  %4180 = vmatprep.subr.mxu1 %v4570_v0  ;;  %v5184_v9 = vadd.f32 0.01, %v1761_v26 }
 0x463   :  { %4181 = vmatpush3.msra.mxu1 %v4789_v28 }
 0x464   :  { %4183 = vmatmul.mubr.msk.f32.vlgmr.msra.gmra.mxu1 %vm256_vm1, %v3680_v1  ;;  %vm1611_vm10 = vcmp.gt.f32.partialorder %v1610_v4, 0.0  ;;  %4196 = vmatprep.subr.mxu1 %v4570_v0  ;;  %v1766_v58 = vmul.f32 %v3680_v1, %v5184_v9 }
 0x465   :  { %v5191_v49 = vsel %vm1611_vm10, 1.0, %v4570_v0  ;;  %4197 = vmatpush3.msra.mxu1 %v4860_v63  ;;  %4204 = vmatprep.mubr.msk.f32.mxu1 %vm4571_vm0, %v4570_v0 }
 0x466   :  { %4194 = vmatmul.mubr.msk.f32.vlgmr.msra.gmra.mxu0 %vm256_vm1, %v5191_v49  ;;  %4198 = vmatprep.subr.mxu1 %v4570_v0 }
 0x467   :  { %4199 = vmatpush3.msra.mxu1 %v4866_v3  ;;  %4208 = vmatpush3.msra.mxu0 %v4907_v34 }
 0x468   :  { %4200 = vmatprep.subr.mxu1 %v4570_v0  ;;  %4209 = vmatprep.subr.mxu0 %v4570_v0 }
 0x469   :  { %4201 = vmatpush3.msra.mxu1 %v4897_v30  ;;  %4210 = vmatpush3.msra.mxu0 %v4913_v37 }
 0x46a   :  { %4202 = vmatprep.subr.mxu1 %v4570_v0  ;;  %4211 = vmatprep.subr.mxu0 %v4570_v0 }
 0x46b   :  { %4203 = vmatpush3.msra.mxu1 %v4902_v32  ;;  %4212 = vmatpush3.msra.mxu0 %v4917_v38 }
 0x46c   :  { %4218 = vmatprep.subr.mxu1 %v4570_v0  ;;  %4213 = vmatprep.subr.mxu0 %v4570_v0 }
 0x46d   :  { %4214 = vmatpush3.msra.mxu0 %v4920_v39  ;;  %4215 = vmatprep.mubr.msk.f32.mxu0 %vm4571_vm0, %v4570_v0 }
 0x46e   :  { %4229 = vmatprep.subr.mxu0 %v4570_v0 }
 0x51c   :  { %v1508_v16 = vpop.f32.mrf.mxu1 }
 0x51d   :  { %v1509_v13 = vadd.f32 %v1508_v16, %v1435_v20  ;;  %v1121_v20 = vadd.f32 %v5113_v2, %v5019_v17 }
 0x51e   :  { %v4162_v25 = vpop.f32.mrf.mxu1 }
 0x51f   :  { %v1512_v6 = vadd.f32 %v5011_v53, %v1509_v13 }
 0x521   :  { %v1519_v50 = vmul.f32 0.048770577, %v1512_v6  ;;  %v2011_v6 = vmul.f32 0.95122945, %v5177_v21 }
 0x523   :  { %v1520_v54 = vadd.f32 %v1519_v50, %v1518_v48 }
 0x524   :  { %v1680_v51 = vpop.f32.mrf.mxu1 }
 0x525   :  { %v5218_v60 = vsub.f32 %v1520_v54, %v5145_v19  ;;  %v1763_v19 = vmul.f32 0.95122945, %v5160_v55 }
 0x526   :  { %v4184_v59 = vpop.f32.mrf.mxu1  ;;  %v1753_v61 = vpop.f32.mrf.mxu0 }
 0x527   :  { %v1754_v14 = vadd.f32 %v1753_v61, %v1680_v51  ;;  %v1523_v1 = vsub.f32 %v5218_v60, %v5138_v18 }
 0x528   :  { %v4195_v56 = vpop.f32.mrf.mxu0 }
 0x529   :  { %v1757_v5 = vadd.f32 %v4939_v52, %v1754_v14  ;;  %vm1524_vm11 = vcmp.gt.f32.partialorder %v1523_v1, 0.0  ;;  %v1924_v14 = vmul.f32 0.95122945, %v5218_v60 }
 0x52a   :  { %v3683_v57 = vsel %vm1524_vm11, 1.0, %v4570_v0 }
 0x52b   :  { %v1764_v47 = vmul.f32 0.048770577, %v1757_v5  ;;  %v5229_v29 = vadd.f32 %v3683_v57, %v1121_v20  ;;  %4205 = vmatmul.mubr.msk.f32.vlgmr.msra.gmra.mxu1 %vm256_vm1, %v3683_v57  ;;  %v1920_v18 = vmul.f32 %v3683_v57, %v5001_v41 }
 0x52c   :  { %4219 = vmatpush3.msra.mxu1 %v4686_v7  ;;  %4226 = vmatprep.mubr.msk.f32.mxu1 %vm4571_vm0, %v4570_v0 }
 0x52d   :  { %v1765_v17 = vadd.f32 %v1764_v47, %v1763_v19  ;;  %v5236_v2 = vadd.f32 %v1920_v18, %v1919_v22  ;;  %4220 = vmatprep.subr.mxu1 %v4570_v0 }
 0x52e   :  { %4221 = vmatpush3.msra.mxu1 %v4691_v8 }
 0x52f   :  { %v5240_v15 = vsub.f32 %v1765_v17, %v1766_v58  ;;  %4222 = vmatprep.subr.mxu1 %v4570_v0  ;;  %v1922_v55 = vmul.f32 1.8, %v5236_v2 }
 0x530   :  { %4223 = vmatpush3.msra.mxu1 %v4701_v10 }
 0x531   :  { %4224 = vmatprep.subr.mxu1 %v4570_v0  ;;  %v1768_v7 = vsub.f32 %v5240_v15, %v5184_v9  ;;  %v5248_v26 = vadd.f32 0.01, %v1922_v55  ;;  %v2325_v55 = vmul.f32 %v5236_v2, %v4998_v40 }
 0x532   :  { %4225 = vmatpush3.msra.mxu1 %v4711_v12  ;;  %v2164_v12 = vmul.f32 %v5173_v11, %v4929_v42 }
 0x533   :  { %4227 = vmatmul.mubr.msk.f32.vlgmr.msra.gmra.mxu1 %vm256_vm1, %v5191_v49  ;;  %vm1769_vm12 = vcmp.gt.f32.partialorder %v1768_v7, 0.0  ;;  %v5254_v8 = vmul.f32 %v3683_v57, %v5248_v26  ;;  %4240 = vmatprep.subr.mxu1 %v4570_v0 }
 0x534   :  { %v3688_v10 = vsel %vm1769_vm12, 1.0, %v4570_v0  ;;  %4241 = vmatpush3.msra.mxu1 %v4803_v31  ;;  %4248 = vmatprep.mubr.msk.f32.mxu1 %vm4571_vm0, %v4570_v0 }
 0x535   :  { %4216 = vmatmul.mubr.msk.f32.vlgmr.msra.gmra.mxu0 %vm256_vm1, %v3688_v10  ;;  %v2165_v4 = vmul.f32 %v3688_v10, %v4932_v46  ;;  %4242 = vmatprep.subr.mxu1 %v4570_v0 }
 0x536   :  { %4230 = vmatpush3.msra.mxu0 %v4762_v23  ;;  %4237 = vmatprep.mubr.msk.f32.mxu0 %vm4571_vm0, %v4570_v0 }
 0x537   :  { %v5269_v9 = vadd.f32 %v2165_v4, %v2164_v12  ;;  %4231 = vmatprep.subr.mxu0 %v4570_v0  ;;  %4243 = vmatpush3.msra.mxu1 %v4815_v33 }
 0x538   :  { %4232 = vmatpush3.msra.mxu0 %v4767_v24  ;;  %4244 = vmatprep.subr.mxu1 %v4570_v0 }
 0x539   :  { %4233 = vmatprep.subr.mxu0 %v4570_v0  ;;  %4245 = vmatpush3.msra.mxu1 %v4825_v35  ;;  %v2167_v31 = vmul.f32 1.8, %v5269_v9 }
 0x53a   :  { %4234 = vmatpush3.msra.mxu0 %v4782_v27  ;;  %4246 = vmatprep.subr.mxu1 %v4570_v0  ;;  %v2007_v27 = vmul.f32 %v5191_v49, %v4847_v45 }
 0x53b   :  { %4235 = vmatprep.subr.mxu0 %v4570_v0  ;;  %4247 = vmatpush3.msra.mxu1 %v4834_v36  ;;  %v5282_v23 = vadd.f32 0.01, %v2167_v31  ;;  %v5366_v31 = vld [vmem:[%s5751_s3 + $0x8] sm:$0xff] }
 0x53c   :  { %4236 = vmatpush3.msra.mxu0 %v4789_v28  ;;  %4262 = vmatprep.subr.mxu1 %v4570_v0  ;;  %v2006_v28 = vmul.f32 %v5110_v62, %v4844_v44 }
 0x53d   :  { %4238 = vmatmul.mubr.msk.f32.vlgmr.msra.gmra.mxu0 %vm256_vm1, %v3688_v10  ;;  %4251 = vmatprep.subr.mxu0 %v4570_v0  ;;  %v5289_v24 = vmul.f32 %v3688_v10, %v5282_v23  ;;  %v5355_v10 = vld [vmem:[%s5751_s3 + $0x10] sm:$0xff] }
 0x53e   :  { %4252 = vmatpush3.msra.mxu0 %v4860_v63  ;;  %4259 = vmatprep.mubr.msk.f32.mxu0 %vm4571_vm0, %v4570_v0  ;;  %v2008_v35 = vadd.f32 %v2007_v27, %v2006_v28  ;;  %v5376_v28 = vld [vmem:[%s5751_s3] sm:$0xff] }
 0x53f   :  { %4253 = vmatprep.subr.mxu0 %v4570_v0 }
 0x540   :  { %4254 = vmatpush3.msra.mxu0 %v4866_v3  ;;  %v2009_v63 = vmul.f32 1.8, %v2008_v35  ;;  %v1934_v3 = vld [vmem:[#allocation2 + $0x20] sm:$0xff]  ;;  %v2412_v60 = vmul.f32 %v2008_v35, %v4844_v44  ;;  %v5387_v35 = vld [vmem:[%s5752_s4 + $0x18] sm:$0xff] }
 0x541   :  { %4255 = vmatprep.subr.mxu0 %v4570_v0 }
 0x542   :  { %4256 = vmatpush3.msra.mxu0 %v4897_v30  ;;  %v2010_v16 = vadd.f32 0.01, %v2009_v63  ;;  %v5403_v63 = vld [vmem:[%s5752_s4 + $0x8] sm:$0xff] }
 0x543   :  { %4257 = vmatprep.subr.mxu0 %v4570_v0 }
 0x544   :  { %4258 = vmatpush3.msra.mxu0 %v4902_v32  ;;  %v2014_v59 = vmul.f32 %v5191_v49, %v2010_v16 }
 0x545   :  { %4273 = vmatprep.subr.mxu0 %v4570_v0 }
 0x5eb   :  { %v1841_v33 = vpop.f32.mrf.mxu1 }
 0x5ed   :  { %v4206_v36 = vpop.f32.mrf.mxu1 }
 0x5ee   :  { %v5396_v36 = vld [vmem:[%s5752_s4 + $0x10] sm:$0xff] }
 0x5f3   :  { %v2001_v11 = vpop.f32.mrf.mxu1 }
 0x5f4   :  { %v2005_v58 = vadd.f32 %v2001_v11, %v1934_v3  ;;  %v5410_v3 = vld [vmem:[%s5752_s4] sm:$0xff] }
 0x5f5   :  { %v1914_v13 = vpop.f32.mrf.mxu0  ;;  %v4228_v25 = vpop.f32.mrf.mxu1 }
 0x5f6   :  { %v2012_v48 = vmul.f32 0.048770577, %v2005_v58  ;;  %v1915_v50 = vadd.f32 %v1914_v13, %v1841_v33 }
 0x5f7   :  { %v4217_v54 = vpop.f32.mrf.mxu0 }
 0x5f8   :  { %v2013_v51 = vadd.f32 %v2012_v48, %v2011_v6  ;;  %v1918_v62 = vadd.f32 %v5011_v53, %v1915_v50  ;;  %v2169_v6 = vmul.f32 0.95122945, %v5240_v15  ;;  %v2570_v15 = vmul.f32 %v5269_v9, %v4929_v42  ;;  %v5443_v9 = vld [vmem:[%s5754_s6 + $0x10] sm:$0xff] }
 0x5fa   :  { %v5308_v61 = vsub.f32 %v2013_v51, %v2014_v59  ;;  %v1925_v1 = vmul.f32 0.048770577, %v1918_v62  ;;  %v2340_v62 = vld [vmem:[#allocation2 + $0x28] sm:$0xff] }
 0x5fc   :  { %v2016_v56 = vsub.f32 %v5308_v61, %v2010_v16  ;;  %v1926_v20 = vadd.f32 %v1925_v1, %v1924_v14 }
 0x5fd   :  { %v2086_v5 = vpop.f32.mrf.mxu0 }
 0x5fe   :  { %v5313_v57 = vsub.f32 %v1926_v20, %v5254_v8  ;;  %vm2017_vm13 = vcmp.gt.f32.partialorder %v2016_v56, 0.0  ;;  %v5341_v8 = vld [vmem:[%s5751_s3 + $0x18] sm:$0xff] }
 0x5ff   :  { %v4239_v21 = vpop.f32.mrf.mxu0  ;;  %v3693_v22 = vsel %vm2017_vm13, 1.0, %v4570_v0 }
 0x600   :  { %4249 = vmatmul.mubr.msk.f32.vlgmr.msra.gmra.mxu1 %vm256_vm1, %v3693_v22  ;;  %v2413_v49 = vmul.f32 %v3693_v22, %v4847_v45  ;;  %v1929_v19 = vsub.f32 %v5313_v57, %v5248_v26 }
 0x601   :  { %4263 = vmatpush3.msra.mxu1 %v4907_v34  ;;  %4270 = vmatprep.mubr.msk.f32.mxu1 %vm4571_vm0, %v4570_v0 }
 0x602   :  { %vm1930_vm14 = vcmp.gt.f32.partialorder %v1929_v19, 0.0  ;;  %4264 = vmatprep.subr.mxu1 %v4570_v0  ;;  %v5325_v47 = vadd.f32 %v2413_v49, %v2412_v60  ;;  %v5453_v60 = vld [vmem:[%s5754_s6 + $0x8] sm:$0xff] }
 0x603   :  { %v3691_v18 = vsel %vm1930_vm14, 1.0, %v4570_v0  ;;  %4265 = vmatpush3.msra.mxu1 %v4913_v37 }
 0x604   :  { %v5330_v17 = vadd.f32 %v3691_v18, %v5229_v29  ;;  %4260 = vmatmul.mubr.msk.f32.vlgmr.msra.gmra.mxu0 %vm256_vm1, %v3691_v18  ;;  %v2326_v7 = vmul.f32 %v3691_v18, %v5001_v41  ;;  %4266 = vmatprep.subr.mxu1 %v4570_v0  ;;  %v2415_v26 = vmul.f32 1.8, %v5325_v47 }
 0x605   :  { %4274 = vmatpush3.msra.mxu0 %v5341_v8  ;;  %4281 = vmatprep.mubr.msk.f32.mxu0 %vm4571_vm0, %v4570_v0 }
 0x606   :  { %v5346_v29 = vadd.f32 %v2326_v7, %v2325_v55  ;;  %4275 = vmatprep.subr.mxu0 %v4570_v0  ;;  %4267 = vmatpush3.msra.mxu1 %v4917_v38  ;;  %v5350_v2 = vadd.f32 0.01, %v2415_v26  ;;  %v5464_v7 = vld [vmem:[%s5754_s6] sm:$0xff] }
 0x607   :  { %4276 = vmatpush3.msra.mxu0 %v5355_v10  ;;  %4268 = vmatprep.subr.mxu1 %v4570_v0 }
 0x608   :  { %4277 = vmatprep.subr.mxu0 %v4570_v0  ;;  %v2420_v12 = vmul.f32 %v3693_v22, %v5350_v2  ;;  %4269 = vmatpush3.msra.mxu1 %v4920_v39  ;;  %v2328_v4 = vmul.f32 1.8, %v5346_v29 }
 0x609   :  { %4278 = vmatpush3.msra.mxu0 %v5366_v31  ;;  %4284 = vmatprep.subr.mxu1 %v4570_v0 }
 0x60a   :  { %4279 = vmatprep.subr.mxu0 %v4570_v0  ;;  %v5371_v27 = vadd.f32 0.01, %v2328_v4  ;;  %v5481_v4 = vld [vmem:[#allocation6 + $0x10] sm:$0xff] }
 0x60b   :  { %4280 = vmatpush3.msra.mxu0 %v5376_v28 }
 0x60c   :  { %4282 = vmatmul.mubr.msk.f32.vlgmr.msra.gmra.mxu0 %vm256_vm1, %v3693_v22  ;;  %4295 = vmatprep.subr.mxu0 %v4570_v0  ;;  %v5382_v33 = vmul.f32 %v3691_v18, %v5371_v27 }
 0x60d   :  { %4296 = vmatpush3.msra.mxu0 %v5387_v35  ;;  %4303 = vmatprep.mubr.msk.f32.mxu0 %vm4571_vm0, %v4570_v0 }
 0x60e   :  { %4297 = vmatprep.subr.mxu0 %v4570_v0 }
 0x60f   :  { %4298 = vmatpush3.msra.mxu0 %v5396_v36 }
 0x610   :  { %4299 = vmatprep.subr.mxu0 %v4570_v0 }
 0x611   :  { %4300 = vmatpush3.msra.mxu0 %v5403_v63 }
 0x612   :  { %4301 = vmatprep.subr.mxu0 %v4570_v0 }
 0x613   :  { %4302 = vmatpush3.msra.mxu0 %v5410_v3 }
 0x614   :  { %4317 = vmatprep.subr.mxu0 %v4570_v0 }
 0x6c0   :  { %v2159_v11 = vpop.f32.mrf.mxu1 }
 0x6c1   :  { %v2160_v58 = vadd.f32 %v2159_v11, %v2086_v5  ;;  %v2417_v5 = vmul.f32 0.95122945, %v5308_v61 }
 0x6c2   :  { %v4250_v16 = vpop.f32.mrf.mxu1 }
 0x6c3   :  { %v2163_v13 = vadd.f32 %v4939_v52, %v2160_v58 }
 0x6c4   :  { %v5415_v25 = vpop.f32.mrf.mxu0 }
 0x6c5   :  { %v2170_v48 = vmul.f32 0.048770577, %v2163_v13 }
 0x6c6   :  { %v4261_v50 = vpop.f32.mrf.mxu0 }
 0x6c7   :  { %v2171_v54 = vadd.f32 %v2170_v48, %v2169_v6 }
 0x6c9   :  { %v5419_v51 = vsub.f32 %v2171_v54, %v5289_v24 }
 0x6cb   :  { %v2174_v59 = vsub.f32 %v5419_v51, %v5282_v23  ;;  %v5432_v23 = vld [vmem:[%s5754_s6 + $0x18] sm:$0xff] }
 0x6cc   :  { %v2407_v14 = vpop.f32.mrf.mxu0 }
 0x6cd   :  { %v2411_v1 = vadd.f32 %v2407_v14, %v2340_v62  ;;  %vm2175_vm15 = vcmp.gt.f32.partialorder %v2174_v59, 0.0  ;;  %v2575_v59 = vmul.f32 0.95122945, %v5419_v51 }
 0x6ce   :  { %v4283_v56 = vpop.f32.mrf.mxu0  ;;  %v3696_v20 = vsel %vm2175_vm15, 1.0, %v4570_v0 }
 0x6cf   :  { %v2418_v21 = vmul.f32 0.048770577, %v2411_v1  ;;  %4271 = vmatmul.mubr.msk.f32.vlgmr.msra.gmra.mxu1 %vm256_vm1, %v3696_v20  ;;  %v2571_v24 = vmul.f32 %v3696_v20, %v4932_v46 }
 0x6d0   :  { %4285 = vmatpush3.msra.mxu1 %v5432_v23  ;;  %4292 = vmatprep.mubr.msk.f32.mxu1 %vm4571_vm0, %v4570_v0 }
 0x6d1   :  { %v2419_v22 = vadd.f32 %v2418_v21, %v2417_v5  ;;  %v5437_v61 = vadd.f32 %v2571_v24, %v2570_v15  ;;  %4286 = vmatprep.subr.mxu1 %v4570_v0 }
 0x6d2   :  { %4287 = vmatpush3.msra.mxu1 %v5443_v9 }
 0x6d3   :  { %v5446_v49 = vsub.f32 %v2419_v22, %v2420_v12  ;;  %4288 = vmatprep.subr.mxu1 %v4570_v0  ;;  %v2573_v19 = vmul.f32 1.8, %v5437_v61  ;;  %v5473_v12 = vld [vmem:[#allocation6 + $0x18] sm:$0xff]  ;;  %v2976_v5 = vmul.f32 %v5437_v61, %v4929_v42 }
 0x6d4   :  { %4289 = vmatpush3.msra.mxu1 %v5453_v60 }
 0x6d5   :  { %v2422_v18 = vsub.f32 %v5446_v49, %v5350_v2  ;;  %4290 = vmatprep.subr.mxu1 %v4570_v0  ;;  %v5459_v55 = vadd.f32 0.01, %v2573_v19  ;;  %v5581_v19 = vld [vmem:[#allocation6 + $0x8] sm:$0xff] }
 0x6d6   :  { %4291 = vmatpush3.msra.mxu1 %v5464_v7 }
 0x6d7   :  { %4293 = vmatmul.mubr.msk.f32.vlgmr.msra.gmra.mxu1 %vm256_vm1, %v3696_v20  ;;  %vm2423_vm2 = vcmp.gt.f32.partialorder %v2422_v18, 0.0  ;;  %4306 = vmatprep.subr.mxu1 %v4570_v0  ;;  %v2578_v26 = vmul.f32 %v3696_v20, %v5459_v55  ;;  %v5585_v18 = vld [vmem:[#allocation6] sm:$0xff] }
 0x6d8   :  { %v5471_v2 = vsel %vm2423_vm2, 1.0, %v4570_v0  ;;  %4307 = vmatpush3.msra.mxu1 %v5473_v12  ;;  %4314 = vmatprep.mubr.msk.f32.mxu1 %vm4571_vm0, %v4570_v0 }
 0x6d9   :  { %4304 = vmatmul.mubr.msk.f32.vlgmr.msra.gmra.mxu0 %vm256_vm1, %v5471_v2  ;;  %4308 = vmatprep.subr.mxu1 %v4570_v0 }
 0x6da   :  { %4309 = vmatpush3.msra.mxu1 %v5481_v4  ;;  %4318 = vmatpush3.msra.mxu0 %v4907_v34 }
 0x6db   :  { %4310 = vmatprep.subr.mxu1 %v4570_v0  ;;  %4319 = vmatprep.subr.mxu0 %v4570_v0 }
 0x6dc   :  { %4311 = vmatpush3.msra.mxu1 %v4897_v30  ;;  %4320 = vmatpush3.msra.mxu0 %v4913_v37 }
 0x6dd   :  { %4312 = vmatprep.subr.mxu1 %v4570_v0  ;;  %4321 = vmatprep.subr.mxu0 %v4570_v0 }
 0x6de   :  { %4313 = vmatpush3.msra.mxu1 %v4902_v32  ;;  %4322 = vmatpush3.msra.mxu0 %v4917_v38  ;;  %v2330_v32 = vmul.f32 0.95122945, %v5313_v57  ;;  %v2731_v57 = vmul.f32 %v5346_v29, %v4998_v40 }
 0x6df   :  { %4328 = vmatprep.subr.mxu1 %v4570_v0  ;;  %4323 = vmatprep.subr.mxu0 %v4570_v0 }
 0x6e0   :  { %4324 = vmatpush3.msra.mxu0 %v4920_v39  ;;  %4325 = vmatprep.mubr.msk.f32.mxu0 %vm4571_vm0, %v4570_v0 }
 0x6e1   :  { %4339 = vmatprep.subr.mxu0 %v4570_v0 }
 0x78f   :  { %v2320_v30 = vpop.f32.mrf.mxu1 }
 0x790   :  { %v2321_v34 = vadd.f32 %v2320_v30, %v5415_v25 }
 0x791   :  { %v4272_v37 = vpop.f32.mrf.mxu1 }
 0x792   :  { %v2324_v11 = vadd.f32 %v5011_v53, %v2321_v34 }
 0x794   :  { %v2331_v38 = vmul.f32 0.048770577, %v2324_v11 }
 0x796   :  { %v2332_v58 = vadd.f32 %v2331_v38, %v2330_v32  ;;  %v2746_v32 = vld [vmem:[#allocation2 + $0x30] sm:$0xff] }
 0x797   :  { %v2492_v16 = vpop.f32.mrf.mxu1 }
 0x798   :  { %v5503_v13 = vsub.f32 %v2332_v58, %v5382_v33 }
 0x799   :  { %v4294_v39 = vpop.f32.mrf.mxu1  ;;  %v2565_v6 = vpop.f32.mrf.mxu0 }
 0x79a   :  { %v2566_v48 = vadd.f32 %v2565_v6, %v2492_v16  ;;  %v2335_v50 = vsub.f32 %v5503_v13, %v5371_v27 }
 0x79b   :  { %v4305_v54 = vpop.f32.mrf.mxu0 }
 0x79c   :  { %v2569_v25 = vadd.f32 %v4939_v52, %v2566_v48  ;;  %vm2336_vm3 = vcmp.gt.f32.partialorder %v2335_v50, 0.0  ;;  %v2823_v48 = vmul.f32 0.95122945, %v5446_v49 }
 0x79d   :  { %v3699_v53 = vsel %vm2336_vm3, 1.0, %v4570_v0 }
 0x79e   :  { %v2576_v62 = vmul.f32 0.048770577, %v2569_v25  ;;  %v5513_v33 = vadd.f32 %v3699_v53, %v5330_v17  ;;  %4315 = vmatmul.mubr.msk.f32.vlgmr.msra.gmra.mxu1 %vm256_vm1, %v3699_v53  ;;  %v2732_v14 = vmul.f32 %v3699_v53, %v5001_v41 }
 0x79f   :  { %4329 = vmatpush3.msra.mxu1 %v5341_v8  ;;  %4336 = vmatprep.mubr.msk.f32.mxu1 %vm4571_vm0, %v4570_v0 }
 0x7a0   :  { %v2577_v52 = vadd.f32 %v2576_v62, %v2575_v59  ;;  %v5520_v27 = vadd.f32 %v2732_v14, %v2731_v57  ;;  %4330 = vmatprep.subr.mxu1 %v4570_v0  ;;  %v2736_v14 = vmul.f32 0.95122945, %v5503_v13 }
 0x7a1   :  { %4331 = vmatpush3.msra.mxu1 %v5355_v10 }
 0x7a2   :  { %v5524_v29 = vsub.f32 %v2577_v52, %v2578_v26  ;;  %4332 = vmatprep.subr.mxu1 %v4570_v0  ;;  %v2734_v17 = vmul.f32 1.8, %v5520_v27  ;;  %v2818_v26 = vmul.f32 %v5325_v47, %v4844_v44  ;;  %v5598_v47 = vld [vmem:[%s5756_s8] ss:$0 sm:$0xff] }
 0x7a3   :  { %4333 = vmatpush3.msra.mxu1 %v5366_v31 }
 0x7a4   :  { %4334 = vmatprep.subr.mxu1 %v4570_v0  ;;  %v2580_v51 = vsub.f32 %v5524_v29, %v5459_v55  ;;  %v5532_v1 = vadd.f32 0.01, %v2734_v17  ;;  %v2819_v55 = vmul.f32 %v5471_v2, %v4847_v45 }
 0x7a5   :  { %4335 = vmatpush3.msra.mxu1 %v5376_v28 }
 0x7a6   :  { %4337 = vmatmul.mubr.msk.f32.vlgmr.msra.gmra.mxu1 %vm256_vm1, %v5471_v2  ;;  %vm2581_vm4 = vcmp.gt.f32.partialorder %v2580_v51, 0.0  ;;  %v5538_v56 = vmul.f32 %v3699_v53, %v5532_v1  ;;  %4350 = vmatprep.subr.mxu1 %v4570_v0  ;;  %v2820_v34 = vadd.f32 %v2819_v55, %v2818_v26  ;;  %v5614_v55 = vld [vmem:[#allocation3 + $0x18] sm:$0xff] }
 0x7a7   :  { %v3704_v20 = vsel %vm2581_vm4, 1.0, %v4570_v0  ;;  %4351 = vmatpush3.msra.mxu1 %v5387_v35  ;;  %4358 = vmatprep.mubr.msk.f32.mxu1 %vm4571_vm0, %v4570_v0 }
 0x7a8   :  { %4326 = vmatmul.mubr.msk.f32.vlgmr.msra.gmra.mxu0 %vm256_vm1, %v3704_v20  ;;  %v2977_v21 = vmul.f32 %v3704_v20, %v4932_v46  ;;  %4352 = vmatprep.subr.mxu1 %v4570_v0  ;;  %v2821_v11 = vmul.f32 1.8, %v2820_v34  ;;  %v3224_v13 = vmul.f32 %v2820_v34, %v4844_v44  ;;  %v3137_v44 = vmul.f32 %v5520_v27, %v4998_v40 }
 0x7a9   :  { %4340 = vmatpush3.msra.mxu0 %v5432_v23  ;;  %4347 = vmatprep.mubr.msk.f32.mxu0 %vm4571_vm0, %v4570_v0 }
 0x7aa   :  { %v5553_v15 = vadd.f32 %v2977_v21, %v2976_v5  ;;  %4341 = vmatprep.subr.mxu0 %v4570_v0  ;;  %4353 = vmatpush3.msra.mxu1 %v5396_v36  ;;  %v2822_v16 = vadd.f32 0.01, %v2821_v11 }
 0x7ab   :  { %4342 = vmatpush3.msra.mxu0 %v5443_v9  ;;  %4354 = vmatprep.subr.mxu1 %v4570_v0 }
 0x7ac   :  { %4343 = vmatprep.subr.mxu0 %v4570_v0  ;;  %4355 = vmatpush3.msra.mxu1 %v5403_v63  ;;  %v2979_v24 = vmul.f32 1.8, %v5553_v15  ;;  %v2826_v57 = vmul.f32 %v5471_v2, %v2822_v16 }
 0x7ad   :  { %4344 = vmatpush3.msra.mxu0 %v5453_v60  ;;  %4356 = vmatprep.subr.mxu1 %v4570_v0 }
 0x7ae   :  { %4345 = vmatprep.subr.mxu0 %v4570_v0  ;;  %4357 = vmatpush3.msra.mxu1 %v5410_v3  ;;  %v5566_v22 = vadd.f32 0.01, %v2979_v24 }
 0x7af   :  { %4346 = vmatpush3.msra.mxu0 %v5464_v7  ;;  %4372 = vmatprep.subr.mxu1 %v4570_v0 }
 0x7b0   :  { %4348 = vmatmul.mubr.msk.f32.vlgmr.msra.gmra.mxu0 %vm256_vm1, %v3704_v20  ;;  %4361 = vmatprep.subr.mxu0 %v4570_v0  ;;  %v5573_v61 = vmul.f32 %v3704_v20, %v5566_v22 }
 0x7b1   :  { %4362 = vmatpush3.msra.mxu0 %v5473_v12  ;;  %4369 = vmatprep.mubr.msk.f32.mxu0 %vm4571_vm0, %v4570_v0 }
 0x7b2   :  { %4363 = vmatprep.subr.mxu0 %v4570_v0 }
 0x7b3   :  { %4364 = vmatpush3.msra.mxu0 %v5481_v4 }
 0x7b4   :  { %4365 = vmatprep.subr.mxu0 %v4570_v0 }
 0x7b5   :  { %4366 = vmatpush3.msra.mxu0 %v5581_v19 }
 0x7b6   :  { %4367 = vmatprep.subr.mxu0 %v4570_v0 }
 0x7b7   :  { %4368 = vmatpush3.msra.mxu0 %v5585_v18 }
 0x7b8   :  { %4383 = vmatprep.subr.mxu0 %v4570_v0 }
 0x85e   :  { %v2653_v30 = vpop.f32.mrf.mxu1 }
 0x860   :  { %v4316_v37 = vpop.f32.mrf.mxu1 }
 0x866   :  { %v2813_v38 = vpop.f32.mrf.mxu1 }
 0x867   :  { %v2817_v58 = vadd.f32 %v2813_v38, %v2746_v32 }
 0x868   :  { %v2726_v39 = vpop.f32.mrf.mxu0  ;;  %v4338_v6 = vpop.f32.mrf.mxu1 }
 0x869   :  { %v2824_v50 = vmul.f32 0.048770577, %v2817_v58  ;;  %v2727_v54 = vadd.f32 %v2726_v39, %v2653_v30  ;;  %v5621_v30 = vld [vmem:[#allocation3 + $0x10] sm:$0xff]  ;;  %v5672_v58 = vld [vmem:[%s5753_s5] ss:$0 sm:$0xff] }
 0x86a   :  { %v4327_v25 = vpop.f32.mrf.mxu0  ;;  %v2981_v39 = vmul.f32 0.95122945, %v5524_v29  ;;  %v3382_v29 = vmul.f32 %v5553_v15, %v4929_v42 }
 0x86b   :  { %v2825_v53 = vadd.f32 %v2824_v50, %v2823_v48  ;;  %v2730_v59 = vadd.f32 %v5598_v47, %v2727_v54  ;;  %v3152_v54 = vld [vmem:[#allocation2 + $0x38] sm:$0xff] }
 0x86d   :  { %v5601_v62 = vsub.f32 %v2825_v53, %v2826_v57  ;;  %v2737_v52 = vmul.f32 0.048770577, %v2730_v59 }
 0x86f   :  { %v2828_v49 = vsub.f32 %v5601_v62, %v2822_v16  ;;  %v2738_v17 = vadd.f32 %v2737_v52, %v2736_v14  ;;  %v3229_v14 = vmul.f32 0.95122945, %v5601_v62 }
 0x870   :  { %v2898_v51 = vpop.f32.mrf.mxu0 }
 0x871   :  { %v5606_v20 = vsub.f32 %v2738_v17, %v5538_v56  ;;  %vm2829_vm5 = vcmp.gt.f32.partialorder %v2828_v49, 0.0 }
 0x872   :  { %v4349_v2 = vpop.f32.mrf.mxu0  ;;  %v3709_v5 = vsel %vm2829_vm5, 1.0, %v4570_v0 }
 0x873   :  { %4359 = vmatmul.mubr.msk.f32.vlgmr.msra.gmra.mxu1 %vm256_vm1, %v3709_v5  ;;  %v3225_v21 = vmul.f32 %v3709_v5, %v4847_v45  ;;  %v2741_v24 = vsub.f32 %v5606_v20, %v5532_v1  ;;  %v3142_v15 = vmul.f32 0.95122945, %v5606_v20 }
 0x874   :  { %4373 = vmatpush3.msra.mxu1 %v5614_v55  ;;  %4380 = vmatprep.mubr.msk.f32.mxu1 %vm4571_vm0, %v4570_v0 }
 0x875   :  { %vm2742_vm6 = vcmp.gt.f32.partialorder %v2741_v24, 0.0  ;;  %4374 = vmatprep.subr.mxu1 %v4570_v0  ;;  %v3226_v56 = vadd.f32 %v3225_v21, %v3224_v13 }
 0x876   :  { %v3707_v26 = vsel %vm2742_vm6, 1.0, %v4570_v0  ;;  %4375 = vmatpush3.msra.mxu1 %v5621_v30 }
 0x877   :  { %v5625_v45 = vadd.f32 %v3707_v26, %v5513_v33  ;;  %4370 = vmatmul.mubr.msk.f32.vlgmr.msra.gmra.mxu0 %vm256_vm1, %v3707_v26  ;;  %v3138_v1 = vmul.f32 %v3707_v26, %v5001_v41  ;;  %4376 = vmatprep.subr.mxu1 %v4570_v0  ;;  %v3227_v34 = vmul.f32 1.8, %v3226_v56  ;;  %v5638_v33 = vld [vmem:[#allocation3 + $0x8] sm:$0xff] }
 0x878   :  { %4384 = vmatpush3.msra.mxu0 %v5341_v8  ;;  %4391 = vmatprep.mubr.msk.f32.mxu0 %vm4571_vm0, %v4570_v0  ;;  %v5644_v8 = vld [vmem:[#allocation3] sm:$0xff] }
 0x879   :  { %v5635_v37 = vadd.f32 %v3138_v1, %v3137_v44  ;;  %4385 = vmatprep.subr.mxu0 %v4570_v0  ;;  %4377 = vmatpush3.msra.mxu1 %v5638_v33  ;;  %v3228_v11 = vadd.f32 0.01, %v3227_v34 }
 0x87a   :  { %4386 = vmatpush3.msra.mxu0 %v5355_v10  ;;  %4378 = vmatprep.subr.mxu1 %v4570_v0 }
 0x87b   :  { %4387 = vmatprep.subr.mxu0 %v4570_v0  ;;  %v3232_v27 = vmul.f32 %v3709_v5, %v3228_v11  ;;  %4379 = vmatpush3.msra.mxu1 %v5644_v8  ;;  %v3140_v32 = vmul.f32 1.8, %v5635_v37 }
 0x87c   :  { %4388 = vmatpush3.msra.mxu0 %v5366_v31  ;;  %4394 = vmatprep.subr.mxu1 %v4570_v0 }
 0x87d   :  { %4389 = vmatprep.subr.mxu0 %v4570_v0  ;;  %v5651_v38 = vadd.f32 0.01, %v3140_v32 }
 0x87e   :  { %4390 = vmatpush3.msra.mxu0 %v5376_v28 }
 0x87f   :  { %4392 = vmatmul.mubr.msk.f32.vlgmr.msra.gmra.mxu0 %vm256_vm1, %v3709_v5  ;;  %4405 = vmatprep.subr.mxu0 %v4570_v0  ;;  %v5657_v10 = vmul.f32 %v3707_v26, %v5651_v38 }
 0x880   :  { %4406 = vmatpush3.msra.mxu0 %v5387_v35  ;;  %4413 = vmatprep.mubr.msk.f32.mxu0 %vm4571_vm0, %v4570_v0 }
 0x881   :  { %4407 = vmatprep.subr.mxu0 %v4570_v0 }
 0x882   :  { %4408 = vmatpush3.msra.mxu0 %v5396_v36 }
 0x883   :  { %4409 = vmatprep.subr.mxu0 %v4570_v0 }
 0x884   :  { %4410 = vmatpush3.msra.mxu0 %v5403_v63 }
 0x885   :  { %4411 = vmatprep.subr.mxu0 %v4570_v0 }
 0x886   :  { %4412 = vmatpush3.msra.mxu0 %v5410_v3 }
 0x887   :  { %4427 = vmatprep.subr.mxu0 %v4570_v0 }
 0x933   :  { %v2971_v31 = vpop.f32.mrf.mxu1 }
 0x934   :  { %v2972_v28 = vadd.f32 %v2971_v31, %v2898_v51  ;;  %v3558_v31 = vld [vmem:[#allocation8] sm:$0xff] }
 0x935   :  { %v4360_v35 = vpop.f32.mrf.mxu1 }
 0x936   :  { %v2975_v36 = vadd.f32 %v5672_v58, %v2972_v28 }
 0x937   :  { %v3059_v16 = vpop.f32.mrf.mxu0 }
 0x938   :  { %v2982_v63 = vmul.f32 0.048770577, %v2975_v36 }
 0x939   :  { %v4371_v6 = vpop.f32.mrf.mxu0 }
 0x93a   :  { %v2983_v48 = vadd.f32 %v2982_v63, %v2981_v39 }
 0x93c   :  { %v5677_v3 = vsub.f32 %v2983_v48, %v5573_v61 }
 0x93e   :  { %v2986_v50 = vsub.f32 %v5677_v3, %v5566_v22  ;;  %v3387_v20 = vmul.f32 0.95122945, %v5677_v3 }
 0x93f   :  { %v3219_v25 = vpop.f32.mrf.mxu0 }
 0x940   :  { %v3223_v53 = vadd.f32 %v3219_v25, %v3152_v54  ;;  %vm2987_vm7 = vcmp.gt.f32.partialorder %v2986_v50, 0.0 }
 0x941   :  { %v4393_v57 = vpop.f32.mrf.mxu0  ;;  %v3712_v59 = vsel %vm2987_vm7, 1.0, %v4570_v0 }
 0x942   :  { %v3230_v52 = vmul.f32 0.048770577, %v3223_v53  ;;  %4381 = vmatmul.mubr.msk.f32.vlgmr.msra.gmra.mxu1 %vm256_vm1, %v3712_v59  ;;  %v3383_v61 = vmul.f32 %v3712_v59, %v4932_v46  ;;  %v3562_v53 = vld [vmem:[%s5759_s11] sm:$0x1] }
 0x943   :  { %4395 = vmatpush3.msra.mxu1 %v5432_v23  ;;  %4402 = vmatprep.mubr.msk.f32.mxu1 %vm4571_vm0, %v4570_v0  ;;  %v3563_v57 = vmul.f32 8.0, %v3562_v53 }
 0x944   :  { %v3231_v22 = vadd.f32 %v3230_v52, %v3229_v14  ;;  %v3384_v49 = vadd.f32 %v3383_v61, %v3382_v29  ;;  %4396 = vmatprep.subr.mxu1 %v4570_v0 }
 0x945   :  { %4397 = vmatpush3.msra.mxu1 %v5443_v9 }
 0x946   :  { %v3233_v62 = vsub.f32 %v3231_v22, %v3232_v27  ;;  %4398 = vmatprep.subr.mxu1 %v4570_v0  ;;  %v3385_v17 = vmul.f32 1.8, %v3384_v49 }
 0x947   :  { %4399 = vmatpush3.msra.mxu1 %v5453_v60 }
 0x948   :  { %v3234_v42 = vsub.f32 %v3233_v62, %v3228_v11  ;;  %4400 = vmatprep.subr.mxu1 %v4570_v0  ;;  %v3386_v46 = vadd.f32 0.01, %v3385_v17 }
 0x949   :  { %4401 = vmatpush3.msra.mxu1 %v5464_v7 }
 0x94a   :  { %4403 = vmatmul.mubr.msk.f32.vlgmr.msra.gmra.mxu1 %vm256_vm1, %v3712_v59  ;;  %vm3235_vm8 = vcmp.gt.f32.partialorder %v3234_v42, 0.0  ;;  %4416 = vmatprep.subr.mxu1 %v4570_v0  ;;  %v3390_v23 = vmul.f32 %v3712_v59, %v3386_v46  ;;  %v3568_v59 = vrot.slane %v3563_v57, %v4841_v43 }
 0x94b   :  { %v3717_v9 = vsel %vm3235_vm8, 1.0, %v4570_v0  ;;  %4417 = vmatpush3.msra.mxu1 %v5473_v12  ;;  %4424 = vmatprep.mubr.msk.f32.mxu1 %vm4571_vm0, %v4570_v0 }
 0x94c   :  { %4414 = vmatmul.mubr.msk.f32.vlgmr.msra.gmra.mxu0 %vm256_vm1, %v3717_v9  ;;  %4418 = vmatprep.subr.mxu1 %v4570_v0 }
 0x94d   :  { %4419 = vmatpush3.msra.mxu1 %v5481_v4  ;;  %4428 = vmatpush3.msra.mxu0 %v5614_v55 }
 0x94e   :  { %4420 = vmatprep.subr.mxu1 %v4570_v0  ;;  %4429 = vmatprep.subr.mxu0 %v4570_v0 }
 0x94f   :  { %4421 = vmatpush3.msra.mxu1 %v5581_v19  ;;  %4430 = vmatpush3.msra.mxu0 %v5621_v30  ;;  %v3543_v30 = vmul.f32 %v5635_v37, %v4998_v40 }
 0x950   :  { %4422 = vmatprep.subr.mxu1 %v4570_v0  ;;  %4431 = vmatprep.subr.mxu0 %v4570_v0 }
 0x951   :  { %4423 = vmatpush3.msra.mxu1 %v5585_v18  ;;  %4432 = vmatpush3.msra.mxu0 %v5638_v33 }
 0x952   :  { %4433 = vmatprep.subr.mxu0 %v4570_v0  ;;  %4435 = vmatprep.mubr.msk.f32.mxu0 %vm4571_vm0, %v4570_v0 }
 0x953   :  { %4434 = vmatpush3.msra.mxu0 %v5644_v8  ;;  %4438 = vmatprep.subr.mxu1 %v4570_v0 }
 0xa02   :  { %v3132_v60 = vpop.f32.mrf.mxu1 }
 0xa03   :  { %v3133_v7 = vadd.f32 %v3132_v60, %v3059_v16 }
 0xa04   :  { %v4382_v12 = vpop.f32.mrf.mxu1 }
 0xa05   :  { %v3136_v4 = vadd.f32 %v5598_v47, %v3133_v7 }
 0xa07   :  { %v3143_v19 = vmul.f32 0.048770577, %v3136_v4 }
 0xa09   :  { %v3144_v18 = vadd.f32 %v3143_v19, %v3142_v15 }
 0xa0a   :  { %v3304_v51 = vpop.f32.mrf.mxu1 }
 0xa0b   :  { %v3146_v2 = vsub.f32 %v3144_v18, %v5657_v10  ;;  %v3559_v10 = vld [vmem:[#allocation8 + $0x8] sm:$0xff] }
 0xa0c   :  { %v4404_v5 = vpop.f32.mrf.mxu1  ;;  %v3377_v21 = vpop.f32.mrf.mxu0 }
 0xa0d   :  { %v3378_v24 = vadd.f32 %v3377_v21, %v3304_v51  ;;  %v3147_v13 = vsub.f32 %v3146_v2, %v5651_v38  ;;  %v3548_v63 = vmul.f32 0.95122945, %v3146_v2 }
 0xa0e   :  { %v4415_v55 = vpop.f32.mrf.mxu0 }
 0xa0f   :  { %v3381_v56 = vadd.f32 %v5672_v58, %v3378_v24  ;;  %vm3148_vm9 = vcmp.gt.f32.partialorder %v3147_v13, 0.0 }
 0xa10   :  { %v3715_v26 = vsel %vm3148_vm9, 1.0, %v4570_v0 }
 0xa11   :  { %v3388_v44 = vmul.f32 0.048770577, %v3381_v56  ;;  %v3151_v1 = vadd.f32 %v3715_v26, %v5625_v45  ;;  %4425 = vmatmul.mubr.msk.f32.vlgmr.msra.gmra.mxu1 %vm256_vm1, %v3715_v26  ;;  %v3544_v34 = vmul.f32 %v3715_v26, %v5001_v41  ;;  %v3561_v45 = vld [vmem:[#allocation8 + $0x18] sm:$0xff]  ;;  %v3560_v41 = vld [vmem:[#allocation8 + $0x10] sm:$0xff] }
 0xa12   :  { %4446 = vmatprep.mubr.msk.f32.mxu1 %vm4571_vm0, %v4570_v0  ;;  %4439 = vmatpush3.msra.mxu1 %v3561_v45 }
 0xa13   :  { %v3389_v33 = vadd.f32 %v3388_v44, %v3387_v20  ;;  %v3545_v11 = vadd.f32 %v3544_v34, %v3543_v30  ;;  %4440 = vmatprep.subr.mxu1 %v4570_v0 }
 0xa14   :  { %4441 = vmatpush3.msra.mxu1 %v3560_v41 }
 0xa15   :  { %v3391_v27 = vsub.f32 %v3389_v33, %v3390_v23  ;;  %v3546_v8 = vmul.f32 1.8, %v3545_v11  ;;  %4442 = vmatprep.subr.mxu1 %v4570_v0 }
 0xa16   :  { %4443 = vmatpush3.msra.mxu1 %v3559_v10 }
 0xa17   :  { %v3392_v32 = vsub.f32 %v3391_v27, %v3386_v46  ;;  %v3547_v38 = vadd.f32 0.01, %v3546_v8  ;;  %4444 = vmatprep.subr.mxu1 %v4570_v0 }
 0xa18   :  { %4445 = vmatpush3.msra.mxu1 %v3558_v31 }
 0xa19   :  { %vm3393_vm10 = vcmp.gt.f32.partialorder %v3392_v32, 0.0  ;;  %v3551_v40 = vmul.f32 %v3715_v26, %v3547_v38 }
 0xa1a   :  { %v3720_v37 = vsel %vm3393_vm10, 1.0, %v4570_v0 }
 0xa1b   :  { %4436 = vmatmul.mubr.msk.f32.vlgmr.msra.gmra.mxu0 %vm256_vm1, %v3720_v37 }
 0xad1   :  { %v3465_v28 = vpop.f32.mrf.mxu1 }
 0xad3   :  { %v4426_v35 = vpop.f32.mrf.mxu1 }
 0xadb   :  { %v3538_v58 = vpop.f32.mrf.mxu0 }
 0xadc   :  { %v3539_v36 = vadd.f32 %v3538_v58, %v3465_v28 }
 0xadd   :  { %v4437_v16 = vpop.f32.mrf.mxu0 }
 0xade   :  { %v3542_v39 = vadd.f32 %v5598_v47, %v3539_v36 }
 0xae0   :  { %v3549_v6 = vmul.f32 0.048770577, %v3542_v39 }
 0xae2   :  { %v3550_v48 = vadd.f32 %v3549_v6, %v3548_v63 }
 0xae4   :  { %v3552_v3 = vsub.f32 %v3550_v48, %v3551_v40 }
 0xae6   :  { %v3553_v50 = vsub.f32 %v3552_v3, %v3547_v38 }
 0xae8   :  { %vm3554_vm0 = vcmp.gt.f32.partialorder %v3553_v50, 0.0 }
 0xae9   :  { %v3723_v54 = vsel %vm3554_vm0, 1.0, %v4570_v0 }
 0xaea   :  { %v3557_v25 = vadd.f32 %v3723_v54, %v3151_v1 }
 0xaec   :  { %4447 = vmatmul.mubr.msk.f32.vlgmr.msra.gmra.mxu1 %vm256_vm1, %v3557_v25 }
 0xbac   :  { %v3639_v47 = vpop.f32.mrf.mxu1 }
 0xbad   :  { %v3640_v14 = vadd.f32 %v3639_v47, %v3568_v59 }
 0xbae   :  { %v4448_v52 = vpop.f32.mrf.mxu1 }
 0xbaf   :  { %3643 = vst [vmem:[#allocation9] sm:$0xff] %v3640_v14 }
 0xbb0   :  { %4550 = shalt.err (!%p4547_p5)
}
 0xbb1   :  { %3653 = dma.vmem_to_hbm [thread:$0]  %s3651_s24, 128, %s5763_s15, [#allocation5]  }
 0xbb2   :  { %4563 = dma.done.wait [#allocation5], 128  }
 0xbb3   :  { %4564 = vsyncadd [#allocation5], 4294967168 }
 0xbb4   :  { %3657 = vsyncpa [#allocation4], 1 }
 0xbb5   :  { %3658 = vsyncpa [#allocation7], 1 }
 0xbb6   :  { %3659 = vsyncpa [#allocation5], 1 }

</bundles_post_ra>
